<compile_context>
chip_gen: v7x
topology: tpu7x:2x2x1
jax: 0.10.0
libtpu: 0.0.40
codegen_flags: <defaults>
</compile_context>

<pallas_src>
import jax
import jax.numpy as jnp
from jax import lax
from jax.experimental import pallas as pl
from jax.experimental.pallas import tpu as pltpu

BN_EPS = 1e-5

# order of the parameter arrays passed to the kernel (after the index tile)
KERNEL_PARAM_KEYS = (
    "emb_table",          # (V, E) embedding table (VMEM-resident)
    "wc", "bc",           # cross network: (L, D) weights, (L, D) biases
    "w1", "b1",           # MLP layer 1 (BN folded in)
    "w2", "b2",           # MLP layer 2 (BN folded in)
    "w3a", "w3b", "b3",   # final linear, split into cross-part / mlp-part rows
)


def _round_up(x, m):
    return (x + m - 1) // m * m


# ----------------------------------------------------------------------------
# Kernel
# ----------------------------------------------------------------------------
def mvfs_dcn_kernel(
    idx_ref,                                 # (TB, F) int32, field offsets pre-added
    emb_ref,                                 # (V, E)  f32 embedding table
    wc_ref, bc_ref,                          # (L, D), (L, D)
    w1_ref, b1_ref,                          # (D, H1), (1, H1)   (BN folded)
    w2_ref, b2_ref,                          # (H1, H2), (1, H2)  (BN folded)
    w3a_ref, w3b_ref, b3_ref,                # (1, D), (1, H2), (1, 1)
    out_ref,                                 # (1, TB) f32
):
    idx = idx_ref[...]                       # (TB, F)
    table = emb_ref[...].astype(jnp.float32) # (V, E)
    tb, num_fields = idx.shape
    vocab, emb_dim = table.shape

    # ---- fused embedding gather: one-hot x table on the (idle) MXU -----------
    # Exact (one-hot entries are 0/1), no HBM round trip for x0, and safe for
    # the zero-padded remainder rows (compares, not loads).
    lane_ids = lax.broadcasted_iota(jnp.int32, (tb, vocab), 1)
    fields = []
    for f in range(num_fields):              # static unroll, F is small
        onehot = (idx[:, f:f + 1] == lane_ids).astype(jnp.float32)        # (TB, V)
        fields.append(jnp.dot(onehot, table, preferred_element_type=jnp.float32))
    x0 = jnp.concatenate(fields, axis=-1)    # (TB, D) field-major flatten

    # ---- CrossNetwork: x_{l+1} = x0 * (x_l . w_l) + b_l + x_l ----------------
    x = x0
    for l in range(wc_ref.shape[0]):         # static unroll (L = 3)
        w = wc_ref[pl.ds(l, 1), :]           # (1, D)
        b = bc_ref[pl.ds(l, 1), :]           # (1, D)
        xw = jnp.sum(x * w, axis=-1, keepdims=True)   # Linear(D, 1, bias=False)
        x = x0 * xw + b + x
    x_l1 = x                                 # (TB, D)

    # ---- MLP: (Linear+BN folded) -> ReLU -> Dropout(identity), x2 ------------
    h = jnp.dot(x0, w1_ref[...], preferred_element_type=jnp.float32) + b1_ref[...]
    h = jnp.maximum(h, 0.0)
    h = jnp.dot(h, w2_ref[...], preferred_element_type=jnp.float32) + b2_ref[...]
    h = jnp.maximum(h, 0.0)                  # (TB, H2)

    # ---- final Linear on concat([x_l1, h], 1), computed pre-transposed so the
    # ---- result is lane-dense (1, TB) -> unmasked stores + dense writeback ----
    dn = (((1,), (1,)), ((), ()))            # contract on the feature dim of both
    p_t = (lax.dot_general(w3a_ref[...], x_l1, dn, preferred_element_type=jnp.float32)
           + lax.dot_general(w3b_ref[...], h, dn, preferred_element_type=jnp.float32)
           + b3_ref[...])                    # (1, TB)
    out_ref[...] = jax.nn.sigmoid(p_t)       # torch.sigmoid(res)


# ----------------------------------------------------------------------------
# Wrapper
# ----------------------------------------------------------------------------
def mvfs_dcn_forward(field_idx, kparams, *, tb=None, tb_max=1024, target_tiles=4):
    """field_idx: (B, num_fields) int. Returns (B,) float32 probabilities.

    `kparams` must come from `prepare_kernel_params` (BN folded, feature axes
    permuted to the gather-natural field-major flatten order).
    """
    emb_table = kparams["emb_table"]
    offsets = kparams["offsets"]                      # (F,) int32
    B, F = field_idx.shape
    V, E = emb_table.shape
    D = E * F

    table_bytes = int(emb_table.size) * emb_table.dtype.itemsize
    if table_bytes > 8 * 1024 * 1024:
        # TODO(synk): large-vocab tables don't fit VMEM; needs a
        # memory_space=pl.ANY table + manual DMA gather path instead of the
        # VMEM-resident one-hot gather used here.
        raise NotImplementedError("emb_table too large for VMEM-resident fused gather")

    # Tiny (B, F) int op; the gather itself is fused into the kernel.
    idx = field_idx.astype(jnp.int32) + offsets[None, :].astype(jnp.int32)

    # ---- batch tile: multiple of 128 (lane-dense output), >= ~target_tiles ---
    if tb is None:
        tb = min(tb_max, max(128, _round_up(-(-B // target_tiles), 128)))
    tb = _round_up(int(tb), 128)
    num_tiles = -(-B // tb)
    b_pad = num_tiles * tb
    if b_pad != B:
        # Only the tiny int32 index array is padded (zeros gather table row 0
        # harmlessly); the padded output columns are sliced off below.
        idx = jnp.pad(idx, ((0, b_pad - B), (0, 0)))

    def full_spec(a):
        n = a.ndim
        return pl.BlockSpec(a.shape, lambda i, _n=n: (0,) * _n)

    in_specs = [pl.BlockSpec((tb, F), lambda i: (i, 0))]
    in_specs += [full_spec(kparams[k]) for k in KERNEL_PARAM_KEYS]

    h1 = kparams["w1"].shape[1]
    h2 = kparams["w2"].shape[1]
    L = kparams["wc"].shape[0]
    param_bytes = sum(int(kparams[k].size) * kparams[k].dtype.itemsize
                      for k in KERNEL_PARAM_KEYS)
    cost = pl.CostEstimate(
        flops=int(b_pad * (2 * (F * V * E + D * h1 + h1 * h2 + D + h2) + 4 * L * D)),
        transcendentals=int(b_pad),
        bytes_accessed=int(b_pad * F * 4 + param_bytes + b_pad * 4),
    )

    out = pl.pallas_call(
        mvfs_dcn_kernel,
        out_shape=jax.ShapeDtypeStruct((1, b_pad), jnp.float32),
        grid=(num_tiles,),
        in_specs=in_specs,
        out_specs=pl.BlockSpec((1, tb), lambda i: (0, i)),
        compiler_params=pltpu.CompilerParams(
            dimension_semantics=("parallel",),        # shard batch tiles over TCs
            vmem_limit_bytes=32 * 1024 * 1024,        # safe on v5e/v6e/v7x
        ),
        cost_estimate=cost,
    )(idx, *(kparams[k] for k in KERNEL_PARAM_KEYS))
    return out[0, :B]                                 # == res.squeeze(1) after sigmoid


# ----------------------------------------------------------------------------
# Parameter construction (torch-equivalent reference layout) + kernel prep
# ----------------------------------------------------------------------------
def init_params(key, field_dims, embed_dim=16, num_layers=3, mlp_dims=(16, 8)):
    # DeepCrossNetworkModel inside MvFS_DCN hard-codes embed_dim=16, so the
    # MvFS embed_dim must be 16 for the shapes to line up (as in the reference).
    assert embed_dim == 16
    F = len(field_dims)
    D = F * embed_dim
    h1, h2 = mlp_dims
    vocab = int(sum(field_dims))
    ks = jax.random.split(key, 8)

    def u(k, shape, bound):
        return jax.random.uniform(k, shape, jnp.float32, -bound, bound)

    emb_limit = (6.0 / (vocab + embed_dim)) ** 0.5
    emb_table = u(ks[0], (vocab, embed_dim), emb_limit)
    offs, acc = [], 0
    for fd in field_dims:
        offs.append(acc)
        acc += fd
    offsets = jnp.asarray(offs, dtype=jnp.int32)

    return {
        "emb_table": emb_table,
        "offsets": offsets,
        # CrossNetwork: L x Linear(D, 1, bias=False) weights + zero bias vectors
        "wc": u(ks[1], (num_layers, D), 1.0 / D ** 0.5),
        "bc": jnp.zeros((num_layers, D), jnp.float32),
        # MLP layer 1: Linear(D, 16) + BatchNorm1d(16) (default running stats)
        "w1": u(ks[2], (D, h1), 1.0 / D ** 0.5),
        "b1": u(ks[3], (1, h1), 1.0 / D ** 0.5),
        "g1": jnp.ones((1, h1), jnp.float32),
        "be1": jnp.zeros((1, h1), jnp.float32),
        "m1": jnp.zeros((1, h1), jnp.float32),
        "v1": jnp.ones((1, h1), jnp.float32),
        # MLP layer 2: Linear(16, 8) + BatchNorm1d(8)
        "w2": u(ks[4], (h1, h2), 1.0 / h1 ** 0.5),
        "b2": u(ks[5], (1, h2), 1.0 / h1 ** 0.5),
        "g2": jnp.ones((1, h2), jnp.float32),
        "be2": jnp.zeros((1, h2), jnp.float32),
        "m2": jnp.zeros((1, h2), jnp.float32),
        "v2": jnp.ones((1, h2), jnp.float32),
        # Final Linear(D + 8, 1) split into cross-part and mlp-part
        "w3a": u(ks[6], (D, 1), 1.0 / (D + h2) ** 0.5),
        "w3b": u(ks[7], (h2, 1), 1.0 / (D + h2) ** 0.5),
        "b3": jnp.zeros((1, 1), jnp.float32),
    }


def _permute_feature_axis(w, E, F, axis):
    """Reorder a length-D=E*F feature axis from the reference embed-major order
    (d = e*F + f, torch's .transpose(1,2).flatten(1)) to the gather-natural
    field-major order (d = f*E + e, the in-kernel per-field concat)."""
    w = jnp.moveaxis(w, axis, 0)
    tail = w.shape[1:]
    w = w.reshape(E, F, *tail)
    w = jnp.swapaxes(w, 0, 1).reshape(E * F, *tail)
    return jnp.moveaxis(w, 0, axis)


def prepare_kernel_params(ref_params, embed_dim, num_fields):
    """One-time: fold eval-mode BatchNorm into the Linears and permute the
    feature (D) axes so the kernel can consume the transpose-free flatten."""
    E, F = embed_dim, num_fields
    p = ref_params

    def fold_bn(w, b, gamma, beta, mean, var):
        s = gamma * jax.lax.rsqrt(var + BN_EPS)       # (1, H)
        return w * s, (b - mean) * s + beta

    w1, b1 = fold_bn(p["w1"], p["b1"], p["g1"], p["be1"], p["m1"], p["v1"])
    w2, b2 = fold_bn(p["w2"], p["b2"], p["g2"], p["be2"], p["m2"], p["v2"])

    return {
        "emb_table": p["emb_table"],
        "offsets": p["offsets"],
        "wc": _permute_feature_axis(p["wc"], E, F, axis=1),
        "bc": _permute_feature_axis(p["bc"], E, F, axis=1),
        "w1": _permute_feature_axis(w1, E, F, axis=0),
        "b1": b1,
        "w2": w2,
        "b2": b2,
        "w3a": _permute_feature_axis(p["w3a"], E, F, axis=0).T,   # (1, D)
        "w3b": p["w3b"].T,                                        # (1, H2)
        "b3": p["b3"],                                            # (1, 1)
    }


# ----------------------------------------------------------------------------
# Pure-JAX reference (mirrors the PyTorch module's eval-mode forward exactly)
# ----------------------------------------------------------------------------
def mvfs_dcn_reference(field_idx, p):
    # TODO(synk): the stage == 1 branch (MvFS_Controller reweighting) is dead
    # code in the module's default forward (self.stage == -1), not implemented.
    emb_table, offsets = p["emb_table"], p["offsets"]
    B, F = field_idx.shape
    E = emb_table.shape[1]
    idx = field_idx + offsets[None, :]
    emb = jnp.take(emb_table, idx, axis=0)                 # (B, F, E)
    x0 = jnp.transpose(emb, (0, 2, 1)).reshape(B, E * F).astype(jnp.float32)

    x = x0
    for l in range(p["wc"].shape[0]):
        xw = jnp.sum(x * p["wc"][l][None, :], axis=-1, keepdims=True)
        x = x0 * xw + p["bc"][l][None, :] + x
    x_l1 = x

    def bn(h, g, be, m, v):
        return (h - m) * jax.lax.rsqrt(v + BN_EPS) * g + be

    h = jnp.maximum(bn(x0 @ p["w1"] + p["b1"], p["g1"], p["be1"], p["m1"], p["v1"]), 0.0)
    h = jnp.maximum(bn(h @ p["w2"] + p["b2"], p["g2"], p["be2"], p["m2"], p["v2"]), 0.0)
    res = x_l1 @ p["w3a"] + h @ p["w3b"] + p["b3"]
    return jax.nn.sigmoid(res[:, 0])


if __name__ == "__main__":
    field_dims = (10, 20, 30, 40)      # 4 sparse fields, vocab = 100
    embed_dim = 16                     # must be 16 (DCN hard-codes embed_dim=16)
    batch = 300                        # exercises multi-tile grid + remainder

    key = jax.random.PRNGKey(0)
    pkey, xkey = jax.random.split(key)
    ref_params = init_params(pkey, field_dims, embed_dim)
    kparams = prepare_kernel_params(ref_params, embed_dim, len(field_dims))

    # deterministic integer field ids, each column within its field's cardinality
    raw = jax.random.randint(xkey, (batch, len(field_dims)), 0, 10_000, dtype=jnp.int32)
    field = raw % jnp.asarray(field_dims, jnp.int32)[None, :]

    out = jax.block_until_ready(mvfs_dcn_forward(field, kparams))
    ref = jax.block_until_ready(mvfs_dcn_reference(field, ref_params))

    assert out.shape == (batch,) and out.dtype == jnp.float32
    assert bool(jnp.all(jnp.isfinite(out)))
    assert bool(jnp.all((out >= 0) & (out <= 1)))
    err = float(jnp.max(jnp.abs(out - ref)))
    assert bool(jnp.allclose(out, ref, rtol=5e-5, atol=5e-5)), err
    print("KERNEL_OK")
</pallas_src>

<mosaic_0001>
module attributes {stable_mosaic.version = 11 : i64} {
  func.func @mvfs_dcn_kernel(%arg0: i32, %arg1: memref<128x4xi32, #tpu.memory_space<vmem>>, %arg2: memref<100x16xf32, #tpu.memory_space<vmem>>, %arg3: memref<3x64xf32, #tpu.memory_space<vmem>>, %arg4: memref<3x64xf32, #tpu.memory_space<vmem>>, %arg5: memref<64x16xf32, #tpu.memory_space<vmem>>, %arg6: memref<1x16xf32, #tpu.memory_space<vmem>>, %arg7: memref<16x8xf32, #tpu.memory_space<vmem>>, %arg8: memref<1x8xf32, #tpu.memory_space<vmem>>, %arg9: memref<1x64xf32, #tpu.memory_space<vmem>>, %arg10: memref<1x8xf32, #tpu.memory_space<vmem>>, %arg11: memref<1x1xf32, #tpu.memory_space<vmem>>, %arg12: memref<1x128xf32, #tpu.memory_space<vmem>>) attributes {dimension_semantics = [#tpu.dimension_semantics<parallel>], iteration_bounds = array<i64: 3>, scalar_prefetch = 0 : i64, scratch_operands = 0 : i64, tpu.core_type = #tpu.core_type<tc>, window_params = [{transform_indices = @transform_0, window_bounds = array<i64: 128, 4>}, {pipeline_mode = #tpu.pipeline_mode<synchronous>, transform_indices = @transform_1, window_bounds = array<i64: 100, 16>}, {pipeline_mode = #tpu.pipeline_mode<synchronous>, transform_indices = @transform_2, window_bounds = array<i64: 3, 64>}, {pipeline_mode = #tpu.pipeline_mode<synchronous>, transform_indices = @transform_3, window_bounds = array<i64: 3, 64>}, {pipeline_mode = #tpu.pipeline_mode<synchronous>, transform_indices = @transform_4, window_bounds = array<i64: 64, 16>}, {pipeline_mode = #tpu.pipeline_mode<synchronous>, transform_indices = @transform_5, window_bounds = array<i64: 1, 16>}, {pipeline_mode = #tpu.pipeline_mode<synchronous>, transform_indices = @transform_6, window_bounds = array<i64: 16, 8>}, {pipeline_mode = #tpu.pipeline_mode<synchronous>, transform_indices = @transform_7, window_bounds = array<i64: 1, 8>}, {pipeline_mode = #tpu.pipeline_mode<synchronous>, transform_indices = @transform_8, window_bounds = array<i64: 1, 64>}, {pipeline_mode = #tpu.pipeline_mode<synchronous>, transform_indices = @transform_9, window_bounds = array<i64: 1, 8>}, {pipeline_mode = #tpu.pipeline_mode<synchronous>, transform_indices = @transform_10, window_bounds = array<i64: 1, 1>}, {transform_indices = @transform_11, window_bounds = array<i64: 1, 128>}]} {
    %c0 = arith.constant 0 : index
    %c0_0 = arith.constant 0 : index
    %0 = vector.load %arg1[%c0, %c0_0] : memref<128x4xi32, #tpu.memory_space<vmem>>, vector<128x4xi32>
    %c0_1 = arith.constant 0 : index
    %c0_2 = arith.constant 0 : index
    %1 = vector.load %arg2[%c0_1, %c0_2] : memref<100x16xf32, #tpu.memory_space<vmem>>, vector<100x16xf32>
    %2 = tpu.iota {dimensions = array<i32: 1>} : vector<128x100xi32>
    %3 = vector.extract_strided_slice %0 {offsets = [0, 0], sizes = [128, 1], strides = [1, 1]} : vector<128x4xi32> to vector<128x1xi32>
    %4 = vector.broadcast %3 : vector<128x1xi32> to vector<128x100xi32>
    %5 = arith.cmpi eq, %4, %2 : vector<128x100xi32>
    %6 = arith.extui %5 : vector<128x100xi1> to vector<128x100xi32>
    %7 = arith.sitofp %6 : vector<128x100xi32> to vector<128x100xf32>
    %cst = arith.constant dense<0.000000e+00> : vector<128x16xf32>
    %8 = tpu.matmul %7, %1, %cst {dimension_numbers = #tpu.dot_dimension_numbers<[1], [0], [0], [1], [0, 0, 1, 1], [], []>} : vector<128x100xf32>, vector<100x16xf32>, vector<128x16xf32> -> vector<128x16xf32>
    %9 = vector.extract_strided_slice %0 {offsets = [0, 1], sizes = [128, 1], strides = [1, 1]} : vector<128x4xi32> to vector<128x1xi32>
    %10 = vector.broadcast %9 : vector<128x1xi32> to vector<128x100xi32>
    %11 = arith.cmpi eq, %10, %2 : vector<128x100xi32>
    %12 = arith.extui %11 : vector<128x100xi1> to vector<128x100xi32>
    %13 = arith.sitofp %12 : vector<128x100xi32> to vector<128x100xf32>
    %cst_3 = arith.constant dense<0.000000e+00> : vector<128x16xf32>
    %14 = tpu.matmul %13, %1, %cst_3 {dimension_numbers = #tpu.dot_dimension_numbers<[1], [0], [0], [1], [0, 0, 1, 1], [], []>} : vector<128x100xf32>, vector<100x16xf32>, vector<128x16xf32> -> vector<128x16xf32>
    %15 = vector.extract_strided_slice %0 {offsets = [0, 2], sizes = [128, 1], strides = [1, 1]} : vector<128x4xi32> to vector<128x1xi32>
    %16 = vector.broadcast %15 : vector<128x1xi32> to vector<128x100xi32>
    %17 = arith.cmpi eq, %16, %2 : vector<128x100xi32>
    %18 = arith.extui %17 : vector<128x100xi1> to vector<128x100xi32>
    %19 = arith.sitofp %18 : vector<128x100xi32> to vector<128x100xf32>
    %cst_4 = arith.constant dense<0.000000e+00> : vector<128x16xf32>
    %20 = tpu.matmul %19, %1, %cst_4 {dimension_numbers = #tpu.dot_dimension_numbers<[1], [0], [0], [1], [0, 0, 1, 1], [], []>} : vector<128x100xf32>, vector<100x16xf32>, vector<128x16xf32> -> vector<128x16xf32>
    %21 = vector.extract_strided_slice %0 {offsets = [0, 3], sizes = [128, 1], strides = [1, 1]} : vector<128x4xi32> to vector<128x1xi32>
    %22 = vector.broadcast %21 : vector<128x1xi32> to vector<128x100xi32>
    %23 = arith.cmpi eq, %22, %2 : vector<128x100xi32>
    %24 = arith.extui %23 : vector<128x100xi1> to vector<128x100xi32>
    %25 = arith.sitofp %24 : vector<128x100xi32> to vector<128x100xf32>
    %cst_5 = arith.constant dense<0.000000e+00> : vector<128x16xf32>
    %26 = tpu.matmul %25, %1, %cst_5 {dimension_numbers = #tpu.dot_dimension_numbers<[1], [0], [0], [1], [0, 0, 1, 1], [], []>} : vector<128x100xf32>, vector<100x16xf32>, vector<128x16xf32> -> vector<128x16xf32>
    %27 = tpu.concatenate %8, %14, %20, %26 in 1 : vector<128x16xf32>, vector<128x16xf32>, vector<128x16xf32>, vector<128x16xf32> -> vector<128x64xf32>
    %c0_6 = arith.constant 0 : index
    %c0_7 = arith.constant 0 : index
    %28 = vector.load %arg3[%c0_6, %c0_7] : memref<3x64xf32, #tpu.memory_space<vmem>>, vector<1x64xf32>
    %c0_8 = arith.constant 0 : index
    %c0_9 = arith.constant 0 : index
    %29 = vector.load %arg4[%c0_8, %c0_9] : memref<3x64xf32, #tpu.memory_space<vmem>>, vector<1x64xf32>
    %30 = vector.broadcast %28 : vector<1x64xf32> to vector<128x64xf32>
    %31 = arith.mulf %27, %30 : vector<128x64xf32>
    %cst_10 = arith.constant dense<0.000000e+00> : vector<128xf32>
    %32 = vector.multi_reduction <add>, %31, %cst_10 [1] : vector<128x64xf32> to vector<128xf32>
    %33 = vector.shape_cast %32 : vector<128xf32> to vector<128x1xf32>
    %34 = vector.broadcast %33 : vector<128x1xf32> to vector<128x64xf32>
    %35 = arith.mulf %27, %34 : vector<128x64xf32>
    %36 = vector.broadcast %29 : vector<1x64xf32> to vector<128x64xf32>
    %37 = arith.addf %35, %36 : vector<128x64xf32>
    %38 = arith.addf %37, %27 : vector<128x64xf32>
    %c1 = arith.constant 1 : index
    %c0_11 = arith.constant 0 : index
    %39 = vector.load %arg3[%c1, %c0_11] : memref<3x64xf32, #tpu.memory_space<vmem>>, vector<1x64xf32>
    %c1_12 = arith.constant 1 : index
    %c0_13 = arith.constant 0 : index
    %40 = vector.load %arg4[%c1_12, %c0_13] : memref<3x64xf32, #tpu.memory_space<vmem>>, vector<1x64xf32>
    %41 = vector.broadcast %39 : vector<1x64xf32> to vector<128x64xf32>
    %42 = arith.mulf %38, %41 : vector<128x64xf32>
    %cst_14 = arith.constant dense<0.000000e+00> : vector<128xf32>
    %43 = vector.multi_reduction <add>, %42, %cst_14 [1] : vector<128x64xf32> to vector<128xf32>
    %44 = vector.shape_cast %43 : vector<128xf32> to vector<128x1xf32>
    %45 = vector.broadcast %44 : vector<128x1xf32> to vector<128x64xf32>
    %46 = arith.mulf %27, %45 : vector<128x64xf32>
    %47 = vector.broadcast %40 : vector<1x64xf32> to vector<128x64xf32>
    %48 = arith.addf %46, %47 : vector<128x64xf32>
    %49 = arith.addf %48, %38 : vector<128x64xf32>
    %c2 = arith.constant 2 : index
    %c0_15 = arith.constant 0 : index
    %50 = vector.load %arg3[%c2, %c0_15] : memref<3x64xf32, #tpu.memory_space<vmem>>, vector<1x64xf32>
    %c2_16 = arith.constant 2 : index
    %c0_17 = arith.constant 0 : index
    %51 = vector.load %arg4[%c2_16, %c0_17] : memref<3x64xf32, #tpu.memory_space<vmem>>, vector<1x64xf32>
    %52 = vector.broadcast %50 : vector<1x64xf32> to vector<128x64xf32>
    %53 = arith.mulf %49, %52 : vector<128x64xf32>
    %cst_18 = arith.constant dense<0.000000e+00> : vector<128xf32>
    %54 = vector.multi_reduction <add>, %53, %cst_18 [1] : vector<128x64xf32> to vector<128xf32>
    %55 = vector.shape_cast %54 : vector<128xf32> to vector<128x1xf32>
    %56 = vector.broadcast %55 : vector<128x1xf32> to vector<128x64xf32>
    %57 = arith.mulf %27, %56 : vector<128x64xf32>
    %58 = vector.broadcast %51 : vector<1x64xf32> to vector<128x64xf32>
    %59 = arith.addf %57, %58 : vector<128x64xf32>
    %60 = arith.addf %59, %49 : vector<128x64xf32>
    %c0_19 = arith.constant 0 : index
    %c0_20 = arith.constant 0 : index
    %61 = vector.load %arg5[%c0_19, %c0_20] : memref<64x16xf32, #tpu.memory_space<vmem>>, vector<64x16xf32>
    %cst_21 = arith.constant dense<0.000000e+00> : vector<128x16xf32>
    %62 = tpu.matmul %27, %61, %cst_21 {dimension_numbers = #tpu.dot_dimension_numbers<[1], [0], [0], [1], [0, 0, 1, 1], [], []>} : vector<128x64xf32>, vector<64x16xf32>, vector<128x16xf32> -> vector<128x16xf32>
    %c0_22 = arith.constant 0 : index
    %c0_23 = arith.constant 0 : index
    %63 = vector.load %arg6[%c0_22, %c0_23] : memref<1x16xf32, #tpu.memory_space<vmem>>, vector<1x16xf32>
    %64 = vector.broadcast %63 : vector<1x16xf32> to vector<128x16xf32>
    %65 = arith.addf %62, %64 : vector<128x16xf32>
    %cst_24 = arith.constant 0.000000e+00 : f32
    %66 = vector.broadcast %cst_24 : f32 to vector<128x16xf32>
    %67 = arith.maximumf %65, %66 : vector<128x16xf32>
    %c0_25 = arith.constant 0 : index
    %c0_26 = arith.constant 0 : index
    %68 = vector.load %arg7[%c0_25, %c0_26] : memref<16x8xf32, #tpu.memory_space<vmem>>, vector<16x8xf32>
    %cst_27 = arith.constant dense<0.000000e+00> : vector<128x8xf32>
    %69 = tpu.matmul %67, %68, %cst_27 {dimension_numbers = #tpu.dot_dimension_numbers<[1], [0], [0], [1], [0, 0, 1, 1], [], []>} : vector<128x16xf32>, vector<16x8xf32>, vector<128x8xf32> -> vector<128x8xf32>
    %c0_28 = arith.constant 0 : index
    %c0_29 = arith.constant 0 : index
    %70 = vector.load %arg8[%c0_28, %c0_29] : memref<1x8xf32, #tpu.memory_space<vmem>>, vector<1x8xf32>
    %71 = vector.broadcast %70 : vector<1x8xf32> to vector<128x8xf32>
    %72 = arith.addf %69, %71 : vector<128x8xf32>
    %cst_30 = arith.constant 0.000000e+00 : f32
    %73 = vector.broadcast %cst_30 : f32 to vector<128x8xf32>
    %74 = arith.maximumf %72, %73 : vector<128x8xf32>
    %c0_31 = arith.constant 0 : index
    %c0_32 = arith.constant 0 : index
    %75 = vector.load %arg9[%c0_31, %c0_32] : memref<1x64xf32, #tpu.memory_space<vmem>>, vector<1x64xf32>
    %cst_33 = arith.constant dense<0.000000e+00> : vector<1x128xf32>
    %76 = tpu.matmul %75, %60, %cst_33 {dimension_numbers = #tpu.dot_dimension_numbers<[1], [1], [0], [0], [0, 0, 1, 0], [], []>} : vector<1x64xf32>, vector<128x64xf32>, vector<1x128xf32> -> vector<1x128xf32>
    %c0_34 = arith.constant 0 : index
    %c0_35 = arith.constant 0 : index
    %77 = vector.load %arg10[%c0_34, %c0_35] : memref<1x8xf32, #tpu.memory_space<vmem>>, vector<1x8xf32>
    %cst_36 = arith.constant dense<0.000000e+00> : vector<1x128xf32>
    %78 = tpu.matmul %77, %74, %cst_36 {dimension_numbers = #tpu.dot_dimension_numbers<[1], [1], [0], [0], [0, 0, 1, 0], [], []>} : vector<1x8xf32>, vector<128x8xf32>, vector<1x128xf32> -> vector<1x128xf32>
    %79 = arith.addf %76, %78 : vector<1x128xf32>
    %c0_37 = arith.constant 0 : index
    %c0_38 = arith.constant 0 : index
    %80 = vector.load %arg11[%c0_37, %c0_38] : memref<1x1xf32, #tpu.memory_space<vmem>>, vector<1x1xf32>
    %81 = vector.broadcast %80 : vector<1x1xf32> to vector<1x128xf32>
    %82 = arith.addf %79, %81 : vector<1x128xf32>
    %83 = arith.negf %82 : vector<1x128xf32>
    %84 = math.exp %83 : vector<1x128xf32>
    %cst_39 = arith.constant 1.000000e+00 : f32
    %85 = vector.broadcast %cst_39 : f32 to vector<1x128xf32>
    %86 = arith.addf %85, %84 : vector<1x128xf32>
    %87 = arith.divf %85, %86 : vector<1x128xf32>
    %c0_40 = arith.constant 0 : index
    %c0_41 = arith.constant 0 : index
    %88 = vector.load %arg12[%c0_40, %c0_41] : memref<1x128xf32, #tpu.memory_space<vmem>>, vector<1x128xf32>
    tpu.vector_store %arg12[%c0_40, %c0_41], %87 {strides = array<i32>} : memref<1x128xf32, #tpu.memory_space<vmem>>, vector<1x128xf32>,
    return
  }
  func.func @transform_0(%arg0: i32) -> (i32, i32) {
    %c0_i32 = arith.constant 0 : i32
    %c0_i32_0 = arith.constant 0 : i32
    return %arg0, %c0_i32 : i32, i32
  }
  func.func @transform_1(%arg0: i32) -> (i32, i32) {
    %c0_i32 = arith.constant 0 : i32
    %c0_i32_0 = arith.constant 0 : i32
    %c0_i32_1 = arith.constant 0 : i32
    return %c0_i32, %c0_i32_0 : i32, i32
  }
  func.func @transform_2(%arg0: i32) -> (i32, i32) {
    %c0_i32 = arith.constant 0 : i32
    %c0_i32_0 = arith.constant 0 : i32
    %c0_i32_1 = arith.constant 0 : i32
    return %c0_i32, %c0_i32_0 : i32, i32
  }
  func.func @transform_3(%arg0: i32) -> (i32, i32) {
    %c0_i32 = arith.constant 0 : i32
    %c0_i32_0 = arith.constant 0 : i32
    %c0_i32_1 = arith.constant 0 : i32
    return %c0_i32, %c0_i32_0 : i32, i32
  }
  func.func @transform_4(%arg0: i32) -> (i32, i32) {
    %c0_i32 = arith.constant 0 : i32
    %c0_i32_0 = arith.constant 0 : i32
    %c0_i32_1 = arith.constant 0 : i32
    return %c0_i32, %c0_i32_0 : i32, i32
  }
  func.func @transform_5(%arg0: i32) -> (i32, i32) {
    %c0_i32 = arith.constant 0 : i32
    %c0_i32_0 = arith.constant 0 : i32
    %c0_i32_1 = arith.constant 0 : i32
    return %c0_i32, %c0_i32_0 : i32, i32
  }
  func.func @transform_6(%arg0: i32) -> (i32, i32) {
    %c0_i32 = arith.constant 0 : i32
    %c0_i32_0 = arith.constant 0 : i32
    %c0_i32_1 = arith.constant 0 : i32
    return %c0_i32, %c0_i32_0 : i32, i32
  }
  func.func @transform_7(%arg0: i32) -> (i32, i32) {
    %c0_i32 = arith.constant 0 : i32
    %c0_i32_0 = arith.constant 0 : i32
    %c0_i32_1 = arith.constant 0 : i32
    return %c0_i32, %c0_i32_0 : i32, i32
  }
  func.func @transform_8(%arg0: i32) -> (i32, i32) {
    %c0_i32 = arith.constant 0 : i32
    %c0_i32_0 = arith.constant 0 : i32
    %c0_i32_1 = arith.constant 0 : i32
    return %c0_i32, %c0_i32_0 : i32, i32
  }
  func.func @transform_9(%arg0: i32) -> (i32, i32) {
    %c0_i32 = arith.constant 0 : i32
    %c0_i32_0 = arith.constant 0 : i32
    %c0_i32_1 = arith.constant 0 : i32
    return %c0_i32, %c0_i32_0 : i32, i32
  }
  func.func @transform_10(%arg0: i32) -> (i32, i32) {
    %c0_i32 = arith.constant 0 : i32
    %c0_i32_0 = arith.constant 0 : i32
    %c0_i32_1 = arith.constant 0 : i32
    return %c0_i32, %c0_i32_0 : i32, i32
  }
  func.func @transform_11(%arg0: i32) -> (i32, i32) {
    %c0_i32 = arith.constant 0 : i32
    %c0_i32_0 = arith.constant 0 : i32
    return %c0_i32, %arg0 : i32, i32
  }
}

</mosaic_0001>

<bundles_post_ra>
// kernel: tpu_custom_call.1
= control target key start
LH: loop header
LB: loop body
LE: loop exit
PB: predicated region body
PF: predicated region fallthrough
CT: control target
= control target key end

     0   :  { %s5470_s0 = inlined_call_operand.vmem [shape: s32[384,4], index: 0, kind: input, shape index: {}]   ;;  %s5471_s1 = inlined_call_operand.vmem [shape: f32[100,16], index: 1, kind: input, shape index: {}]   ;;  %s5472_s2 = inlined_call_operand.vmem [shape: f32[3,64], index: 2, kind: input, shape index: {}]   ;;  %s5473_s3 = inlined_call_operand.vmem [shape: f32[3,64], index: 3, kind: input, shape index: {}]   ;;  %s5474_s4 = inlined_call_operand.vmem [shape: f32[64,16], index: 4, kind: input, shape index: {}]   ;;  %s5475_s5 = inlined_call_operand.vmem [shape: f32[1,16], index: 5, kind: input, shape index: {}]   ;;  %s5476_s6 = inlined_call_operand.vmem [shape: f32[16,8], index: 6, kind: input, shape index: {}]   ;;  %s5477_s7 = inlined_call_operand.vmem [shape: f32[1,8], index: 7, kind: input, shape index: {}]   ;;  %s5478_s8 = inlined_call_operand.vmem [shape: f32[1,64], index: 8, kind: input, shape index: {}]   ;;  %s5479_s9 = inlined_call_operand.vmem [shape: f32[1,8], index: 9, kind: input, shape index: {}]   ;;  %s5480_s10 = inlined_call_operand.<no memory space> [shape: f32[1,1], index: 10, kind: input, shape index: {}]   ;;  %s5481_s11 = inlined_call_operand.hbm [shape: f32[1,384], index: 11, kind: output, shape index: {}]  }
   0x1   :  { %v16_v0 = vstv %s5480_s10 }
   0x2   :  { %17 = vst [vmem:[#allocation2] sm:$0x1] %v16_v0 }
   0x3   :  { %18 = vsyncpa [#allocation4], 0 }
   0x4   :  { %20 = vsyncpa [#allocation4 + $0x1], 0  ;;  %s4120_s19 = smov 0   ;;  %s4122_s20 = smov 0  }
   0x5   :  { %s4124_s21 = smov 0   ;;  %s4126_s22 = smov 0  }
   0x6 LB: > { %s2962_s10 = sadd.s32 4294967295, %s4044_s22   ;;  %s2963_s23 = sadd.s32 4294967294, %s4044_s22   ;;  %s4044_s22 = sphi %s4126_s22, %s5491_s22   ;;  %s4040_s21 = sphi %s4124_s21, %s5490_s21   ;;  %s4036_s20 = sphi %s4122_s20, %s5489_s20   ;;  %s4032_s19 = sphi %s4120_s19, %s5488_s19  }
   0x7   : > { %s4143_s24 = sadd.s32 1, %s4044_s22   ;;  %s269_s25 = sadd.s32 1, %s4040_s21 }
   0x8   : > { %s266_s26 = ssub.s32 %s4044_s22, %s4143_s24  ;;  %p279_p0 = scmp.ne.s32.totalorder %s4040_s21, %s4036_s20 }
   0x9   : > { %p267_p1 = scmp.eq.s32.totalorder %s266_s26, 0  ;;  %p280_p2 = scmp.eq.s32.totalorder %s2962_s10, 2 }
   0xa   : > { %p285_p3 = scmp.ne.s32.totalorder %s4036_s20, %s4032_s19  ;;  %p286_p4 = scmp.eq.s32.totalorder %s2963_s23, 2 }
   0xb   : > { %s4153_s27 = scalar_select %p267_p1, %s4040_s21, %s269_s25  }
   0xc   : > { %p4155_p5 = por %p280_p2, %p279_p0  ;;  %p4159_p6 = por %p286_p4, %p285_p3 }
   0xd   : > { %p2966_p7 = scmp.ge.s32.totalorder %s4044_s22, 1  ;;  %p343_p8 = scmp.lt.s32.totalorder %s4044_s22, 4 }
   0xf   : > { %p344_p9 = pnand %p2966_p7, %p343_p8 }
  0x10   : > { %s4165_s30 = sshll.u32 (!%p344_p9), %s2962_s10, 4  ;;  %v404_v1 = vld [vmem:[%s5471_s1] sm:$0xff] (!%p344_p9)  ;;  %v4046_v2 = vmov (!%p344_p9), 1   ;;  %v4047_v3 = vmov (!%p344_p9), 0   ;;  %v405_v4 = vld [vmem:[%s5471_s1 + $0x8] sm:$0xff] (!%p344_p9)  ;;  %v406_v5 = vld [vmem:[%s5471_s1 + $0x10] sm:$0xff] (!%p344_p9)  ;;  %v417_v40 = vlaneseq (!%p344_p9) }
  0x11   : > { %347 = sbr.rel (%p344_p9) target bundleno = 1388 (0x56c), region = 64  ;;  %3939 = vset.pattern.permute.xlu1 (!%p344_p9), %v4046_v2  ;;  %3938 = vset.pattern.permute.xlu0 (!%p344_p9), %v4047_v3  ;;  %p383_p10 = scmp.lt.s32.totalorder (!%p344_p9), %s4165_s30, 47  ;;  %v407_v6 = vld [vmem:[%s5471_s1 + $0x18] sm:$0xff] (!%p344_p9)  ;;  %v4182_v7 = vpack.c.bf16 (!%p344_p9), %v405_v4, %v404_v1  ;;  %v408_v9 = vld [vmem:[%s5471_s1 + $0x20] sm:$0xff] (!%p344_p9)  ;;  %v409_v10 = vld [vmem:[%s5471_s1 + $0x28] sm:$0xff] (!%p344_p9)  ;;  %vm564_vm0 = vcmask (!%p344_p9), 1043456  }
  0x12   : > { %v4184_v8 = vpack.c.bf16 (!%p344_p9), %v407_v6, %v406_v5  ;;  %v4204_v11 = vpack.c.bf16 (!%p344_p9), %v409_v10, %v408_v9  ;;  %v410_v13 = vld [vmem:[%s5471_s1 + $0x30] sm:$0xff] (!%p344_p9)  ;;  %v411_v14 = vld [vmem:[%s5471_s1 + $0x38] sm:$0xff] (!%p344_p9)  ;;  %v412_v17 = vld [vmem:[%s5471_s1 + $0x40] sm:$0xff] (!%p344_p9)  ;;  %v4048_v35 = vmov (!%p344_p9), 2   ;;  %v4049_v37 = vmov (!%p344_p9), 3   ;;  %s4052_s18 = smov (!%p344_p9), 32   ;;  %s5428_s15 = scalar_lea.hbm (!%p344_p9), %s5481_s11, %s4165_s30 }
  0x13   : > { %3734 = vmatprep.subr.bf16.mxu1 (!%p344_p9), %v4182_v7  ;;  %3710 = vmatprep.subr.bf16.mxu0 (!%p344_p9), %v4182_v7  ;;  %v4224_v16 = vpack.c.bf16 (!%p344_p9), %v411_v14, %v410_v13  ;;  %v413_v18 = vld [vmem:[%s5471_s1 + $0x48] sm:$0xff] (!%p344_p9)  ;;  %v414_v22 = vld [vmem:[%s5471_s1 + $0x50] sm:$0xff] (!%p344_p9)  ;;  %v415_v23 = vld [vmem:[%s5471_s1 + $0x58] sm:$0xff] (!%p344_p9)  ;;  %v4380_v41 = vand.u32 (!%p344_p9), 127, %v417_v40  ;;  %vm515_vm1 = vcmask (!%p344_p9), 818176   ;;  %v4050_v44 = vmov (!%p344_p9), 0.0  }
  0x14   : > { %3736 = vmatpush3.bf16.msra.mxu1 (!%p344_p9), %v4182_v7  ;;  %3712 = vmatpush3.bf16.msra.mxu0 (!%p344_p9), %v4182_v7  ;;  %v4244_v21 = vpack.c.bf16 (!%p344_p9), %v413_v18, %v412_v17  ;;  %v4262_v25 = vpack.c.bf16 (!%p344_p9), %v415_v23, %v414_v22  ;;  %v4281_v28 = vld [vmem:[%s5471_s1 + $0x60] sm:$0xf] (!%p344_p9)  ;;  %s4053_s10 = smov (!%p344_p9), 48   ;;  %s380_s25 = sand.u32 (!%p344_p9), 1, %s4036_s20  }
  0x15   : > { %3738 = vmatprep.subr.bf16.mxu1 (!%p344_p9), %v4184_v8  ;;  %3714 = vmatprep.subr.bf16.mxu0 (!%p344_p9), %v4184_v8  ;;  %s381_s26 = scalar_lea.vmem (!%p344_p9), [#allocation3], %s380_s25  ;;  %s2896_s16 = scalar_lea.sflag (!%p344_p9), [#allocation4], %s380_s25 }
  0x16   : > { %s2908_s12 = sshll.u32 (!%p344_p9), %s381_s26, 4  ;;  %s5430_s12 = int_to_ptr.vmem [resolvable:$true] %s2908_s12 }
  0x18   : > { %s384_s23 = scalar_select %p383_p10, %s4165_s30, 47  ;;  %3740 = vmatpush3.bf16.msra.mxu1 %v4184_v8  ;;  %3716 = vmatpush3.bf16.msra.mxu0 %v4184_v8 }
  0x19   : > { %3742 = vmatprep.subr.bf16.mxu1 %v4204_v11  ;;  %3718 = vmatprep.subr.bf16.mxu0 %v4204_v11 }
  0x1a   : > { %s2968_s14 = sshll.u32 %s384_s23, 3 }
  0x1b   : > { %s4200_s17 = scalar_lea.vmem %s5470_s0, %s2968_s14 }
  0x1c   : > { %v4207_v12 = vld [vmem:[%s4200_s17] sm:$0xff]  ;;  %v4218_v15 = vld [vmem:[%s4200_s17 + $0x8] sm:$0xff]  ;;  %v4235_v19 = vld [vmem:[%s4200_s17 + $0x10] sm:$0xff]  ;;  %3744 = vmatpush3.bf16.msra.mxu1 %v4204_v11  ;;  %3720 = vmatpush3.bf16.msra.mxu0 %v4204_v11 }
  0x1d   : > { %714 = vperm.xlu1 %3939, %v4207_v12   ;;  %420 = vperm.xlu0 %3938, %v4207_v12   ;;  %v4240_v20 = vld [vmem:[%s4200_s17 + $0x18] sm:$0xff]  ;;  %v4256_v24 = vld [vmem:[%s4200_s17 + $0x28] sm:$0xff]  ;;  %v4267_v26 = vld [vmem:[%s4200_s17 + $0x30] sm:$0xff] }
  0x1e   : > { %3746 = vmatprep.subr.bf16.mxu1 %v4224_v16  ;;  %3722 = vmatprep.subr.bf16.mxu0 %v4224_v16  ;;  %v4276_v27 = vld [vmem:[%s4200_s17 + $0x20] sm:$0xff]  ;;  %v4284_v29 = vld [vmem:[%s4200_s17 + $0x48] sm:$0xff]  ;;  %v398_v30 = vld [vmem:[%s4200_s17 + $0x50] sm:$0xff] }
  0x1f   : > { %v4305_v31 = vld [vmem:[%s4200_s17 + $0x68] sm:$0xff]  ;;  %v402_v32 = vld [vmem:[%s4200_s17 + $0x70] sm:$0xff]  ;;  %v4311_v33 = vld [vmem:[%s4200_s17 + $0x38] sm:$0xff] }
  0x20   : > { %3748 = vmatpush3.bf16.msra.mxu1 %v4224_v16  ;;  %3724 = vmatpush3.bf16.msra.mxu0 %v4224_v16  ;;  %v4320_v34 = vld [vmem:[%s4200_s17 + $0x40] sm:$0xff]  ;;  %v4330_v36 = vld [vmem:[%s4200_s17 + $0x58] sm:$0xff] }
  0x21   : > { %717 = vperm.xlu1 %3939, %v4218_v15   ;;  %423 = vperm.xlu0 %3938, %v4218_v15   ;;  %v4341_v38 = vld [vmem:[%s4200_s17 + $0x60] sm:$0xff]  ;;  %v4353_v39 = vld [vmem:[%s4200_s17 + $0x78] sm:$0xff]  ;;  %s4051_s17 = smov 16  }
  0x22   : > { %3750 = vmatprep.subr.bf16.mxu1 %v4244_v21  ;;  %3726 = vmatprep.subr.bf16.mxu0 %v4244_v21 }
  0x24   : > { %3752 = vmatpush3.bf16.msra.mxu1 %v4244_v21  ;;  %3728 = vmatpush3.bf16.msra.mxu0 %v4244_v21 }
  0x25   : > { %3940 = vset.pattern.permute.xlu1 %v4047_v3  ;;  %426 = vperm.xlu0 %3938, %v4235_v19  }
  0x26   : > { %429 = vperm.xlu1 %3940, %v4240_v20   ;;  %3754 = vmatprep.subr.bf16.mxu1 %v4262_v25 }
  0x27   : > { %3730 = vmatprep.subr.bf16.mxu0 %v4262_v25 }
  0x28   : > { %3756 = vmatpush3.bf16.msra.mxu1 %v4262_v25  ;;  %3732 = vmatpush3.bf16.msra.mxu0 %v4262_v25 }
  0x29   : > { %435 = vperm.xlu0 %3938, %v4256_v24   ;;  %3445 = vmatprep.subr.msk.mxu1 %vm564_vm0, %v4281_v28 }
  0x2a   : > { %3941 = vset.pattern.permute.xlu1 %v4046_v2  ;;  %3395 = vmatprep.subr.msk.mxu0 %vm564_vm0, %v4281_v28 }
  0x2b   : > { %723 = vperm.xlu1 %3941, %v4240_v20  }
  0x2c   : > { %3446 = vmatpush3.msk.msra.mxu1 %vm564_vm0, %v4281_v28  ;;  %3396 = vmatpush3.msk.msra.mxu0 %vm564_vm0, %v4281_v28 }
  0x2d   : > { %438 = vperm.xlu0 %3938, %v4267_v26   ;;  %3782 = vmatprep.subr.bf16.mxu1 %v4182_v7 }
  0x2e   : > { %3758 = vmatprep.subr.bf16.mxu0 %v4182_v7 }
  0x2f   : > { %3942 = vset.pattern.permute.xlu1 %v4047_v3 }
  0x30   : > { %432 = vperm.xlu1 %3942, %v4276_v27  }
  0x31   : > { %447 = vperm.xlu0 %3938, %v4284_v29  }
  0x34   : > { %3943 = vset.pattern.permute.xlu1 %v4046_v2 }
  0x35   : > { %726 = vperm.xlu1 %3943, %v4276_v27   ;;  %450 = vperm.xlu0 %3938, %v398_v30  }
  0x39   : > { %729 = vperm.xlu1 %3943, %v4256_v24   ;;  %459 = vperm.xlu0 %3938, %v4305_v31  }
  0x3d   : > { %3944 = vset.pattern.permute.xlu1 %v4047_v3  ;;  %462 = vperm.xlu0 %3938, %v402_v32  }
  0x3e   : > { %441 = vperm.xlu1 %3944, %v4311_v33  }
  0x41   : > { %3952 = vset.pattern.permute.xlu0 %v4046_v2 }
  0x42   : > { %3945 = vset.pattern.permute.xlu1 %v4046_v2  ;;  %720 = vperm.xlu0 %3952, %v4235_v19  }
  0x43   : > { %735 = vperm.xlu1 %3945, %v4311_v33  }
  0x46   : > { %732 = vperm.xlu0 %3952, %v4267_v26  }
  0x47   : > { %3946 = vset.pattern.permute.xlu1 %v4047_v3 }
  0x48   : > { %444 = vperm.xlu1 %3946, %v4320_v34  }
  0x4a   : > { %744 = vperm.xlu0 %3952, %v398_v30  }
  0x4c   : > { %3947 = vset.pattern.permute.xlu1 %v4046_v2 }
  0x4d   : > { %738 = vperm.xlu1 %3947, %v4320_v34  }
  0x4e   : > { %756 = vperm.xlu0 %3952, %v402_v32  }
  0x51   : > { %741 = vperm.xlu1 %3947, %v4284_v29  }
  0x52   : > { %3956 = vset.pattern.permute.xlu0 %v4048_v35 }
  0x53   : > { %1006 = vperm.xlu0 %3956, %v4218_v15  }
  0x55   : > { %3948 = vset.pattern.permute.xlu1 %v4047_v3 }
  0x56   : > { %453 = vperm.xlu1 %3948, %v4330_v36  }
  0x57   : > { %1009 = vperm.xlu0 %3956, %v4235_v19  }
  0x5a   : > { %3949 = vset.pattern.permute.xlu1 %v4046_v2 }
  0x5b   : > { %747 = vperm.xlu1 %3949, %v4330_v36   ;;  %3959 = vset.pattern.permute.xlu0 %v4049_v37 }
  0x5c   : > { %1298 = vperm.xlu0 %3959, %v4235_v19  }
  0x5f   : > { %3950 = vset.pattern.permute.xlu1 %v4047_v3 }
  0x60   : > { %456 = vperm.xlu1 %3950, %v4341_v38   ;;  %1310 = vperm.xlu0 %3959, %v4267_v26  }
  0x64   : > { %3951 = vset.pattern.permute.xlu1 %v4046_v2  ;;  %3964 = vset.pattern.permute.xlu0 %v4048_v35 }
  0x65   : > { %750 = vperm.xlu1 %3951, %v4341_v38   ;;  %1018 = vperm.xlu0 %3964, %v4256_v24  }
  0x69   : > { %753 = vperm.xlu1 %3951, %v4305_v31   ;;  %1021 = vperm.xlu0 %3964, %v4267_v26  }
  0x6d   : > { %3953 = vset.pattern.permute.xlu1 %v4047_v3  ;;  %1030 = vperm.xlu0 %3964, %v4284_v29  }
  0x6e   : > { %465 = vperm.xlu1 %3953, %v4353_v39  }
  0x71   : > { %1033 = vperm.xlu0 %3964, %v398_v30  }
  0x72   : > { %3954 = vset.pattern.permute.xlu1 %v4046_v2 }
  0x73   : > { %759 = vperm.xlu1 %3954, %v4353_v39  }
  0x75   : > { %3969 = vset.pattern.permute.xlu0 %v4049_v37 }
  0x76   : > { %1322 = vperm.xlu0 %3969, %v398_v30  }
  0x77   : > { %3955 = vset.pattern.permute.xlu1 %v4048_v35 }
  0x78   : > { %1003 = vperm.xlu1 %3955, %v4207_v12  }
  0x7a   : > { %3972 = vset.pattern.permute.xlu0 %v4048_v35 }
  0x7b   : > { %1042 = vperm.xlu0 %3972, %v4305_v31  }
  0x7c   : > { %3957 = vset.pattern.permute.xlu1 %v4049_v37 }
  0x7d   : > { %1292 = vperm.xlu1 %3957, %v4207_v12  }
  0x7f   : > { %1045 = vperm.xlu0 %3972, %v402_v32  }
  0x81   : > { %1295 = vperm.xlu1 %3957, %v4218_v15  }
  0x83   : > { %3975 = vset.pattern.permute.xlu0 %v4049_v37 }
  0x84   : > { %1334 = vperm.xlu0 %3975, %v402_v32  }
  0x85   : > { %3958 = vset.pattern.permute.xlu1 %v4048_v35 }
  0x86   : > { %1012 = vperm.xlu1 %3958, %v4240_v20  }
  0x88   : > { %3977 = vset.pattern.permute.xlu0 %v4047_v3 }
  0x8a   : > { %3960 = vset.pattern.permute.xlu1 %v4049_v37 }
  0x8b   : > { %1301 = vperm.xlu1 %3960, %v4240_v20  }
  0x8f   : > { %3961 = vset.pattern.permute.xlu1 %v4048_v35 }
  0x90   : > { %1015 = vperm.xlu1 %3961, %v4276_v27  }
  0x94   : > { %3962 = vset.pattern.permute.xlu1 %v4049_v37 }
  0x95   : > { %1304 = vperm.xlu1 %3962, %v4276_v27  }
  0x99   : > { %1307 = vperm.xlu1 %3962, %v4256_v24  }
  0x9c   : > { %v715_v42 = vpop.permute.xlu1 %714  ;;  %v421_v43 = vpop.permute.xlu0 %420 }
  0x9d   : > { %3963 = vset.pattern.permute.xlu1 %v4048_v35  ;;  %vm761_vm2 = vcmp.eq.s32.totalorder %v715_v42, %v4380_v41  ;;  %vm467_vm3 = vcmp.eq.s32.totalorder %v421_v43, %v4380_v41 }
  0x9e   : > { %1024 = vperm.xlu1 %3963, %v4311_v33   ;;  %v3002_v45 = vsel %vm761_vm2, 1.0, %v4050_v44  ;;  %v2969_v46 = vsel %vm467_vm3, 1.0, %v4050_v44 }
  0x9f   : > { %3447 = vmatprep.mubr.msk.f32.mxu1 %vm515_vm1, %v3002_v45  ;;  %3397 = vmatprep.mubr.msk.f32.mxu0 %vm515_vm1, %v2969_v46 }
  0xa0   : > { %v718_v47 = vpop.permute.xlu1 %717  ;;  %v424_v48 = vpop.permute.xlu0 %423 }
  0xa1   : > { %vm762_vm4 = vcmp.eq.s32.totalorder %v718_v47, %v4380_v41  ;;  %vm468_vm5 = vcmp.eq.s32.totalorder %v424_v48, %v4380_v41 }
  0xa2   : > { %v3003_v49 = vsel %vm762_vm4, 1.0, %v4050_v44  ;;  %v2970_v50 = vsel %vm468_vm5, 1.0, %v4050_v44  ;;  %3965 = vset.pattern.permute.xlu1 %v4049_v37 }
  0xa3   : > { %1313 = vperm.xlu1 %3965, %v4311_v33   ;;  %3448 = vmatmul.mubr.msk.f32.vlgmr.msra.gmra.mrb[0].mxu1 %vm515_vm1, %v3003_v49 }
  0xa4   : > { %3398 = vmatmul.mubr.msk.f32.vlgmr.msra.gmra.mrb[0].mxu0 %vm515_vm1, %v2970_v50  ;;  %v427_v51 = vpop.permute.xlu0 %426  ;;  %3784 = vmatpush3.bf16.msra.mxu1 %v4182_v7 }
  0xa5   : > { %vm469_vm6 = vcmp.eq.s32.totalorder %v427_v51, %v4380_v41  ;;  %v430_v52 = vpop.permute.xlu1 %429  ;;  %3760 = vmatpush3.bf16.msra.mxu0 %v4182_v7  ;;  %3786 = vmatprep.subr.bf16.mxu1 %v4184_v8 }
  0xa6   : > { %v2971_v53 = vsel %vm469_vm6, 1.0, %v4050_v44  ;;  %vm470_vm7 = vcmp.eq.s32.totalorder %v430_v52, %v4380_v41  ;;  %3762 = vmatprep.subr.bf16.mxu0 %v4184_v8 }
  0xa7   : > { %v2972_v54 = vsel %vm470_vm7, 1.0, %v4050_v44  ;;  %3966 = vset.pattern.permute.xlu1 %v4048_v35  ;;  %3400 = vmatprep.mubr.msk.f32.mxu0 %vm515_vm1, %v2971_v53 }
  0xa8   : > { %1027 = vperm.xlu1 %3966, %v4320_v34   ;;  %3401 = vmatmul.mubr.msk.f32.gmra.mrb[2].mxu0 %vm515_vm1, %v2972_v54  ;;  %v436_v55 = vpop.permute.xlu0 %435 }
  0xa9   : > { %3764 = vmatpush3.bf16.msra.mxu0 %v4184_v8  ;;  %3788 = vmatpush3.bf16.msra.mxu1 %v4184_v8  ;;  %vm472_vm8 = vcmp.eq.s32.totalorder %v436_v55, %v4380_v41 }
  0xaa   : > { %v724_v56 = vpop.permute.xlu1 %723  ;;  %3766 = vmatprep.subr.bf16.mxu0 %v4204_v11  ;;  %3790 = vmatprep.subr.bf16.mxu1 %v4204_v11  ;;  %v2974_v59 = vsel %vm472_vm8, 1.0, %v4050_v44 }
  0xab   : > { %vm764_vm12 = vcmp.eq.s32.totalorder %v724_v56, %v4380_v41 }
  0xac   : > { %3967 = vset.pattern.permute.xlu1 %v4049_v37  ;;  %v439_v57 = vpop.permute.xlu0 %438  ;;  %v3005_v9 = vsel %vm764_vm12, 1.0, %v4050_v44 }
  0xad   : > { %1316 = vperm.xlu1 %3967, %v4320_v34   ;;  %3768 = vmatpush3.bf16.msra.mxu0 %v4204_v11  ;;  %vm473_vm9 = vcmp.eq.s32.totalorder %v439_v57, %v4380_v41 }
  0xae   : > { %3770 = vmatprep.subr.bf16.mxu0 %v4224_v16  ;;  %3792 = vmatpush3.bf16.msra.mxu1 %v4204_v11  ;;  %v2975_v61 = vsel %vm473_vm9, 1.0, %v4050_v44 }
  0xaf   : > { %v433_v58 = vpop.permute.xlu1 %432  ;;  %3794 = vmatprep.subr.bf16.mxu1 %v4224_v16 }
  0xb0   : > { %vm471_vm10 = vcmp.eq.s32.totalorder %v433_v58, %v4380_v41  ;;  %v448_v60 = vpop.permute.xlu0 %447 }
  0xb1   : > { %v2973_v62 = vsel %vm471_vm10, 1.0, %v4050_v44  ;;  %1319 = vperm.xlu1 %3967, %v4284_v29   ;;  %3772 = vmatpush3.bf16.msra.mxu0 %v4224_v16  ;;  %vm476_vm15 = vcmp.eq.s32.totalorder %v448_v60, %v4380_v41 }
  0xb2   : > { %3403 = vmatprep.mubr.msk.f32.mxu0 %vm515_vm1, %v2973_v62  ;;  %3774 = vmatprep.subr.bf16.mxu0 %v4244_v21  ;;  %v2978_v14 = vsel %vm476_vm15, 1.0, %v4050_v44 }
  0xb3   : > { %3404 = vmatmul.mubr.msk.f32.gmra.mrb[4].mxu0 %vm515_vm1, %v2974_v59  ;;  %3796 = vmatpush3.bf16.msra.mxu1 %v4224_v16 }
  0xb4   : > { %v727_v63 = vpop.permute.xlu1 %726  ;;  %v451_v0 = vpop.permute.xlu0 %450  ;;  %3406 = vmatprep.mubr.msk.f32.mxu0 %vm515_vm1, %v2975_v61  ;;  %3798 = vmatprep.subr.bf16.mxu1 %v4244_v21 }
  0xb5   : > { %3968 = vset.pattern.permute.xlu1 %v4048_v35  ;;  %3776 = vmatpush3.bf16.msra.mxu0 %v4244_v21  ;;  %vm765_vm13 = vcmp.eq.s32.totalorder %v727_v63, %v4380_v41  ;;  %vm477_vm2 = vcmp.eq.s32.totalorder %v451_v0, %v4380_v41 }
  0xb6   : > { %1036 = vperm.xlu1 %3968, %v4330_v36   ;;  %3778 = vmatprep.subr.bf16.mxu0 %v4262_v25  ;;  %v3006_v10 = vsel %vm765_vm13, 1.0, %v4050_v44  ;;  %v2979_v16 = vsel %vm477_vm2, 1.0, %v4050_v44 }
  0xb7   : > { %3800 = vmatpush3.bf16.msra.mxu1 %v4244_v21 }
  0xb8   : > { %v730_v1 = vpop.permute.xlu1 %729  ;;  %v4439_v2 = vpop.permute.xlu0 %459  ;;  %3802 = vmatprep.subr.bf16.mxu1 %v4262_v25 }
  0xb9   : > { %3780 = vmatpush3.bf16.msra.mxu0 %v4262_v25 }
  0xba   : > { %3970 = vset.pattern.permute.xlu1 %v4049_v37  ;;  %3495 = vmatprep.subr.msk.mxu0 %vm564_vm0, %v4281_v28 }
  0xbb   : > { %1325 = vperm.xlu1 %3970, %v4330_v36   ;;  %3804 = vmatpush3.bf16.msra.mxu1 %v4262_v25 }
  0xbc   : > { %v4448_v3 = vpop.permute.xlu0 %462  ;;  %3545 = vmatprep.subr.msk.mxu1 %vm564_vm0, %v4281_v28 }
  0xbd   : > { %v442_v4 = vpop.permute.xlu1 %441  ;;  %3496 = vmatpush3.msk.msra.mxu0 %vm564_vm0, %v4281_v28  ;;  %vm481_vm12 = vcmp.eq.s32.totalorder %v4448_v3, %v4380_v41 }
  0xbe   : > { %vm474_vm11 = vcmp.eq.s32.totalorder %v442_v4, %v4380_v41  ;;  %v2983_v32 = vsel %vm481_vm12, 1.0, %v4050_v44 }
  0xbf   : > { %v2976_v5 = vsel %vm474_vm11, 1.0, %v4050_v44  ;;  %3971 = vset.pattern.permute.xlu1 %v4048_v35  ;;  %3546 = vmatpush3.msk.msra.mxu1 %vm564_vm0, %v4281_v28  ;;  %vm766_vm0 = vcmp.eq.s32.totalorder %v730_v1, %v4380_v41  ;;  %vm480_vm11 = vcmp.eq.s32.totalorder %v4439_v2, %v4380_v41 }
  0xc0   : > { %1039 = vperm.xlu1 %3971, %v4341_v38   ;;  %3407 = vmatmul.mubr.msk.f32.gmra.mrb[6].mxu0 %vm515_vm1, %v2976_v5  ;;  %v3007_v15 = vsel %vm766_vm0, 1.0, %v4050_v44 }
  0xc1   : > { %v721_v6 = vpop.permute.xlu0 %720 }
  0xc2   : > { %vm763_vm14 = vcmp.eq.s32.totalorder %v721_v6, %v4380_v41  ;;  %v736_v7 = vpop.permute.xlu1 %735 }
  0xc3   : > { %v3004_v8 = vsel %vm763_vm14, 1.0, %v4050_v44  ;;  %vm768_vm5 = vcmp.eq.s32.totalorder %v736_v7, %v4380_v41 }
  0xc4   : > { %3973 = vset.pattern.permute.xlu1 %v4049_v37  ;;  %3450 = vmatprep.mubr.msk.f32.mxu1 %vm515_vm1, %v3004_v8  ;;  %v3009_v19 = vsel %vm768_vm5, 1.0, %v4050_v44 }
  0xc5   : > { %1328 = vperm.xlu1 %3973, %v4341_v38   ;;  %3451 = vmatmul.mubr.msk.f32.gmra.mrb[2].mxu1 %vm515_vm1, %v3005_v9  ;;  %v733_v11 = vpop.permute.xlu0 %732 }
  0xc6   : > { %3453 = vmatprep.mubr.msk.f32.mxu1 %vm515_vm1, %v3006_v10  ;;  %vm767_vm3 = vcmp.eq.s32.totalorder %v733_v11, %v4380_v41 }
  0xc7   : > { %v445_v12 = vpop.permute.xlu1 %444  ;;  %v3008_v13 = vsel %vm767_vm3, 1.0, %v4050_v44 }
  0xc8   : > { %vm475_vm4 = vcmp.eq.s32.totalorder %v445_v12, %v4380_v41 }
  0xc9   : > { %v2977_v17 = vsel %vm475_vm4, 1.0, %v4050_v44  ;;  %1331 = vperm.xlu1 %3973, %v4305_v31   ;;  %3454 = vmatmul.mubr.msk.f32.gmra.mrb[4].mxu1 %vm515_vm1, %v3007_v15  ;;  %v745_v18 = vpop.permute.xlu0 %744  ;;  %v2982_v31 = vsel %vm480_vm11, 1.0, %v4050_v44 }
  0xca   : > { %3409 = vmatprep.mubr.msk.f32.mxu0 %vm515_vm1, %v2977_v17  ;;  %3456 = vmatprep.mubr.msk.f32.mxu1 %vm515_vm1, %v3008_v13  ;;  %vm771_vm7 = vcmp.eq.s32.totalorder %v745_v18, %v4380_v41 }
  0xcb   : > { %3410 = vmatmul.mubr.msk.f32.gmra.mrb[8].mxu0 %vm515_vm1, %v2978_v14  ;;  %v3012_v23 = vsel %vm771_vm7, 1.0, %v4050_v44 }
  0xcc   : > { %v739_v20 = vpop.permute.xlu1 %738  ;;  %3412 = vmatprep.mubr.msk.f32.mxu0 %vm515_vm1, %v2979_v16 }
  0xcd   : > { %vm769_vm6 = vcmp.eq.s32.totalorder %v739_v20, %v4380_v41  ;;  %3974 = vset.pattern.permute.xlu1 %v4048_v35  ;;  %3457 = vmatmul.mubr.msk.f32.gmra.mrb[6].mxu1 %vm515_vm1, %v3009_v19  ;;  %v757_v33 = vpop.permute.xlu0 %756 }
  0xce   : > { %v3010_v21 = vsel %vm769_vm6, 1.0, %v4050_v44  ;;  %1048 = vperm.xlu1 %3974, %v4353_v39   ;;  %vm775_vm15 = vcmp.eq.s32.totalorder %v757_v33, %v4380_v41 }
  0xcf   : > { %3459 = vmatprep.mubr.msk.f32.mxu1 %vm515_vm1, %v3010_v21 }
  0xd0   : > { %v742_v22 = vpop.permute.xlu1 %741 }
  0xd1   : > { %vm770_vm8 = vcmp.eq.s32.totalorder %v742_v22, %v4380_v41 }
  0xd2   : > { %v3011_v24 = vsel %vm770_vm8, 1.0, %v4050_v44  ;;  %3976 = vset.pattern.permute.xlu1 %v4049_v37  ;;  %v3016_v37 = vsel %vm775_vm15, 1.0, %v4050_v44  ;;  %v1007_v43 = vpop.permute.xlu0 %1006 }
  0xd3   : > { %1337 = vperm.xlu1 %3976, %v4353_v39   ;;  %3460 = vmatmul.mubr.msk.f32.gmra.mrb[8].mxu1 %vm515_vm1, %v3011_v24  ;;  %vm1051_vm4 = vcmp.eq.s32.totalorder %v1007_v43, %v4380_v41 }
  0xd4   : > { %3462 = vmatprep.mubr.msk.f32.mxu1 %vm515_vm1, %v3012_v23  ;;  %v3036_v49 = vsel %vm1051_vm4, 1.0, %v4050_v44 }
  0xd5   : > { %v454_v25 = vpop.permute.xlu1 %453 }
  0xd6   : > { %vm478_vm9 = vcmp.eq.s32.totalorder %v454_v25, %v4380_v41  ;;  %v1010_v46 = vpop.permute.xlu0 %1009 }
  0xd7   : > { %v2980_v26 = vsel %vm478_vm9, 1.0, %v4050_v44  ;;  %vm1052_vm5 = vcmp.eq.s32.totalorder %v1010_v46, %v4380_v41 }
  0xd8   : > { %3413 = vmatmul.mubr.msk.f32.gmra.mrb[10].mxu0 %vm515_vm1, %v2980_v26  ;;  %v3037_v51 = vsel %vm1052_vm5, 1.0, %v4050_v44 }
  0xda   : > { %v748_v27 = vpop.permute.xlu1 %747 }
  0xdb   : > { %vm772_vm10 = vcmp.eq.s32.totalorder %v748_v27, %v4380_v41  ;;  %v1299_v52 = vpop.permute.xlu0 %1298 }
  0xdc   : > { %v3013_v28 = vsel %vm772_vm10, 1.0, %v4050_v44  ;;  %vm1341_vm8 = vcmp.eq.s32.totalorder %v1299_v52, %v4380_v41 }
  0xdd   : > { %3463 = vmatmul.mubr.msk.f32.gmra.mrb[10].mxu1 %vm515_vm1, %v3013_v28  ;;  %v3070_v56 = vsel %vm1341_vm8, 1.0, %v4050_v44 }
  0xdf   : > { %v457_v29 = vpop.permute.xlu1 %456  ;;  %v1311_v57 = vpop.permute.xlu0 %1310 }
  0xe0   : > { %vm479_vm13 = vcmp.eq.s32.totalorder %v457_v29, %v4380_v41 }
  0xe1   : > { %v2981_v30 = vsel %vm479_vm13, 1.0, %v4050_v44 }
  0xe2   : > { %3415 = vmatprep.mubr.msk.f32.mxu0 %vm515_vm1, %v2981_v30 }
  0xe3   : > { %3416 = vmatmul.mubr.msk.f32.gmra.mrb[12].mxu0 %vm515_vm1, %v2982_v31 }
  0xe4   : > { %v751_v34 = vpop.permute.xlu1 %750  ;;  %3418 = vmatprep.mubr.msk.f32.mxu0 %vm515_vm1, %v2983_v32  ;;  %v1019_v61 = vpop.permute.xlu0 %1018 }
  0xe5   : > { %vm773_vm14 = vcmp.eq.s32.totalorder %v751_v34, %v4380_v41  ;;  %vm1055_vm12 = vcmp.eq.s32.totalorder %v1019_v61, %v4380_v41 }
  0xe6   : > { %v3014_v35 = vsel %vm773_vm14, 1.0, %v4050_v44  ;;  %v3040_v2 = vsel %vm1055_vm12, 1.0, %v4050_v44 }
  0xe7   : > { %3465 = vmatprep.mubr.msk.f32.mxu1 %vm515_vm1, %v3014_v35 }
  0xe8   : > { %v754_v36 = vpop.permute.xlu1 %753  ;;  %v1022_v63 = vpop.permute.xlu0 %1021 }
  0xe9   : > { %vm774_vm0 = vcmp.eq.s32.totalorder %v754_v36, %v4380_v41  ;;  %vm1056_vm13 = vcmp.eq.s32.totalorder %v1022_v63, %v4380_v41 }
  0xea   : > { %v3015_v38 = vsel %vm774_vm0, 1.0, %v4050_v44  ;;  %v3041_v4 = vsel %vm1056_vm13, 1.0, %v4050_v44  ;;  %vm1345_vm0 = vcmp.eq.s32.totalorder %v1311_v57, %v4380_v41 }
  0xeb   : > { %3466 = vmatmul.mubr.msk.f32.gmra.mrb[12].mxu1 %vm515_vm1, %v3015_v38  ;;  %v3074_v8 = vsel %vm1345_vm0, 1.0, %v4050_v44 }
  0xec   : > { %3468 = vmatprep.mubr.msk.f32.mxu1 %vm515_vm1, %v3016_v37  ;;  %v1031_v12 = vpop.permute.xlu0 %1030 }
  0xed   : > { %v466_v39 = vpop.permute.xlu1 %465  ;;  %vm1059_vm5 = vcmp.eq.s32.totalorder %v1031_v12, %v4380_v41 }
  0xee   : > { %vm482_vm2 = vcmp.eq.s32.totalorder %v466_v39, %v4380_v41  ;;  %v3044_v18 = vsel %vm1059_vm5, 1.0, %v4050_v44 }
  0xef   : > { %v2984_v42 = vsel %vm482_vm2, 1.0, %v4050_v44 }
  0xf0   : > { %3419 = vmatmul.mubr.msk.f32.gmra.mrb[14].mxu0 %vm515_vm1, %v2984_v42  ;;  %v1034_v15 = vpop.permute.xlu0 %1033 }
  0xf2   : > { %v760_v45 = vpop.permute.xlu1 %759 }
  0xf3   : > { %vm776_vm3 = vcmp.eq.s32.totalorder %v760_v45, %v4380_v41 }
  0xf4   : > { %v3017_v47 = vsel %vm776_vm3, 1.0, %v4050_v44 }
  0xf5   : > { %3469 = vmatmul.mubr.msk.f32.gmra.mrb[14].mxu1 %vm515_vm1, %v3017_v47  ;;  %v1323_v20 = vpop.permute.xlu0 %1322 }
  0xf7   : > { %v1004_v48 = vpop.permute.xlu1 %1003 }
  0xf8   : > { %vm1050_vm6 = vcmp.eq.s32.totalorder %v1004_v48, %v4380_v41 }
  0xf9   : > { %v3035_v50 = vsel %vm1050_vm6, 1.0, %v4050_v44  ;;  %vm1060_vm6 = vcmp.eq.s32.totalorder %v1034_v15, %v4380_v41 }
  0xfa   : > { %3497 = vmatprep.mubr.msk.f32.mxu0 %vm515_vm1, %v3035_v50  ;;  %v3045_v19 = vsel %vm1060_vm6, 1.0, %v4050_v44  ;;  %v1043_v28 = vpop.permute.xlu0 %1042  ;;  %vm1789_vm6 = vcmask 261120  }
  0xfb   : > { %3498 = vmatmul.mubr.msk.f32.vlgmr.msra.gmra.mrb[16].mxu0 %vm515_vm1, %v3036_v49  ;;  %vm1063_vm13 = vcmp.eq.s32.totalorder %v1043_v28, %v4380_v41 }
  0xfc   : > { %v1293_v53 = vpop.permute.xlu1 %1292  ;;  %3500 = vmatprep.mubr.msk.f32.mxu0 %vm515_vm1, %v3037_v51  ;;  %v3048_v33 = vsel %vm1063_vm13, 1.0, %v4050_v44 }
  0xfd   : > { %vm1339_vm7 = vcmp.eq.s32.totalorder %v1293_v53, %v4380_v41 }
  0xfe   : > { %v3068_v54 = vsel %vm1339_vm7, 1.0, %v4050_v44  ;;  %v1046_v30 = vpop.permute.xlu0 %1045 }
  0xff   : > { %3547 = vmatprep.mubr.msk.f32.mxu1 %vm515_vm1, %v3068_v54 }
 0x100   : > { %v1296_v55 = vpop.permute.xlu1 %1295 }
 0x101   : > { %vm1340_vm9 = vcmp.eq.s32.totalorder %v1296_v55, %v4380_v41 }
 0x102   : > { %v3069_v58 = vsel %vm1340_vm9, 1.0, %v4050_v44  ;;  %vm1349_vm9 = vcmp.eq.s32.totalorder %v1323_v20, %v4380_v41 }
 0x103   : > { %3548 = vmatmul.mubr.msk.f32.vlgmr.msra.gmra.mrb[16].mxu1 %vm515_vm1, %v3069_v58  ;;  %v3078_v24 = vsel %vm1349_vm9, 1.0, %v4050_v44  ;;  %v1335_v36 = vpop.permute.xlu0 %1334  ;;  %vm4055_vm9 = vmmov 0  }
 0x104   : > { %3550 = vmatprep.mubr.msk.f32.mxu1 %vm515_vm1, %v3070_v56 }
 0x105   : > { %v1013_v59 = vpop.permute.xlu1 %1012 }
 0x106   : > { %vm1053_vm10 = vcmp.eq.s32.totalorder %v1013_v59, %v4380_v41 }
 0x107   : > { %v3038_v60 = vsel %vm1053_vm10, 1.0, %v4050_v44 }
 0x108   : > { %3501 = vmatmul.mubr.msk.f32.gmra.mrb[18].mxu0 %vm515_vm1, %v3038_v60 }
 0x10a   : > { %v1302_v62 = vpop.permute.xlu1 %1301 }
 0x10b   : > { %vm1342_vm11 = vcmp.eq.s32.totalorder %v1302_v62, %v4380_v41 }
 0x10c   : > { %v3071_v0 = vsel %vm1342_vm11, 1.0, %v4050_v44 }
 0x10d   : > { %3551 = vmatmul.mubr.msk.f32.gmra.mrb[18].mxu1 %vm515_vm1, %v3071_v0 }
 0x10f   : > { %v1016_v1 = vpop.permute.xlu1 %1015 }
 0x110   : > { %vm1054_vm14 = vcmp.eq.s32.totalorder %v1016_v1, %v4380_v41 }
 0x111   : > { %v3039_v3 = vsel %vm1054_vm14, 1.0, %v4050_v44  ;;  %vm1064_vm14 = vcmp.eq.s32.totalorder %v1046_v30, %v4380_v41 }
 0x112   : > { %3503 = vmatprep.mubr.msk.f32.mxu0 %vm515_vm1, %v3039_v3  ;;  %v3049_v35 = vsel %vm1064_vm14, 1.0, %v4050_v44 }
 0x113   : > { %3504 = vmatmul.mubr.msk.f32.gmra.mrb[20].mxu0 %vm515_vm1, %v3040_v2 }
 0x114   : > { %v1305_v5 = vpop.permute.xlu1 %1304  ;;  %3506 = vmatprep.mubr.msk.f32.mxu0 %vm515_vm1, %v3041_v4 }
 0x115   : > { %vm1343_vm15 = vcmp.eq.s32.totalorder %v1305_v5, %v4380_v41 }
 0x116   : > { %v3072_v6 = vsel %vm1343_vm15, 1.0, %v4050_v44 }
 0x117   : > { %3553 = vmatprep.mubr.msk.f32.mxu1 %vm515_vm1, %v3072_v6 }
 0x118   : > { %v1308_v7 = vpop.permute.xlu1 %1307 }
 0x119   : > { %vm1344_vm2 = vcmp.eq.s32.totalorder %v1308_v7, %v4380_v41 }
 0x11a   : > { %v3073_v9 = vsel %vm1344_vm2, 1.0, %v4050_v44  ;;  %vm1353_vm2 = vcmp.eq.s32.totalorder %v1335_v36, %v4380_v41 }
 0x11b   : > { %3554 = vmatmul.mubr.msk.f32.gmra.mrb[20].mxu1 %vm515_vm1, %v3073_v9  ;;  %v3082_v42 = vsel %vm1353_vm2, 1.0, %v4050_v44 }
 0x11c   : > { %3556 = vmatprep.mubr.msk.f32.mxu1 %vm515_vm1, %v3074_v8 }
 0x11d   : > { %v1025_v10 = vpop.permute.xlu1 %1024 }
 0x11e   : > { %vm1057_vm3 = vcmp.eq.s32.totalorder %v1025_v10, %v4380_v41  ;;  %v2190_v10 = vld [vmem:[%s5474_s4] sm:$0xff] }
 0x11f   : > { %v3042_v11 = vsel %vm1057_vm3, 1.0, %v4050_v44 }
 0x120   : > { %3507 = vmatmul.mubr.msk.f32.gmra.mrb[22].mxu0 %vm515_vm1, %v3042_v11  ;;  %v2191_v11 = vld [vmem:[%s5474_s4 + $0x8] sm:$0xff] }
 0x121   : > { %v3805_v12 = vpack.c.bf16 %v2191_v11, %v2190_v10 }
 0x122   : > { %v1314_v13 = vpop.permute.xlu1 %1313 }
 0x123   : > { %vm1346_vm4 = vcmp.eq.s32.totalorder %v1314_v13, %v4380_v41  ;;  %3806 = vmatprep.subr.bf16.mxu0 %v3805_v12  ;;  %v2192_v13 = vld [vmem:[%s5474_s4 + $0x10] sm:$0xff] }
 0x124   : > { %v3075_v14 = vsel %vm1346_vm4, 1.0, %v4050_v44  ;;  %3808 = vmatpush3.bf16.msra.mxu0 %v3805_v12 }
 0x125   : > { %3557 = vmatmul.mubr.msk.f32.gmra.mrb[22].mxu1 %vm515_vm1, %v3075_v14  ;;  %v2193_v14 = vld [vmem:[%s5474_s4 + $0x18] sm:$0xff] }
 0x127   : > { %v1028_v16 = vpop.permute.xlu1 %1027 }
 0x128   : > { %vm1058_vm7 = vcmp.eq.s32.totalorder %v1028_v16, %v4380_v41  ;;  %v3809_v16 = vpack.c.bf16 %v2193_v14, %v2192_v13 }
 0x129   : > { %v3043_v17 = vsel %vm1058_vm7, 1.0, %v4050_v44  ;;  %vm1806_vm7 = vcmask 392192  }
 0x12a   : > { %3509 = vmatprep.mubr.msk.f32.mxu0 %vm515_vm1, %v3043_v17  ;;  %3810 = vmatprep.subr.bf16.mxu0 %v3809_v16 }
 0x12b   : > { %3510 = vmatmul.mubr.msk.f32.gmra.mrb[24].mxu0 %vm515_vm1, %v3044_v18  ;;  %v2194_v18 = vld [vmem:[%s5474_s4 + $0x20] sm:$0xff] }
 0x12c   : > { %v1317_v21 = vpop.permute.xlu1 %1316  ;;  %3512 = vmatprep.mubr.msk.f32.mxu0 %vm515_vm1, %v3045_v19  ;;  %3812 = vmatpush3.bf16.msra.mxu0 %v3809_v16  ;;  %v2195_v19 = vld [vmem:[%s5474_s4 + $0x28] sm:$0xff] }
 0x12d   : > { %vm1347_vm8 = vcmp.eq.s32.totalorder %v1317_v21, %v4380_v41  ;;  %v3813_v21 = vpack.c.bf16 %v2195_v19, %v2194_v18 }
 0x12e   : > { %v3076_v22 = vsel %vm1347_vm8, 1.0, %v4050_v44  ;;  %vm1845_vm8 = vcmask 523264  }
 0x12f   : > { %3559 = vmatprep.mubr.msk.f32.mxu1 %vm515_vm1, %v3076_v22  ;;  %v2196_v22 = vld [vmem:[%s5474_s4 + $0x30] sm:$0xff]  ;;  %3814 = vmatprep.subr.bf16.mxu0 %v3813_v21 }
 0x130   : > { %v1320_v23 = vpop.permute.xlu1 %1319  ;;  %3816 = vmatpush3.bf16.msra.mxu0 %v3813_v21 }
 0x131   : > { %vm1348_vm10 = vcmp.eq.s32.totalorder %v1320_v23, %v4380_v41  ;;  %v2197_v23 = vld [vmem:[%s5474_s4 + $0x38] sm:$0xff] }
 0x132   : > { %v3077_v25 = vsel %vm1348_vm10, 1.0, %v4050_v44  ;;  %vm2634_vm10 = vcmask 64512  }
 0x133   : > { %3560 = vmatmul.mubr.msk.f32.gmra.mrb[24].mxu1 %vm515_vm1, %v3077_v25  ;;  %v3817_v25 = vpack.c.bf16 %v2197_v23, %v2196_v22 }
 0x134   : > { %3562 = vmatprep.mubr.msk.f32.mxu1 %vm515_vm1, %v3078_v24 }
 0x135   : > { %v1037_v26 = vpop.permute.xlu1 %1036  ;;  %3818 = vmatprep.subr.bf16.mxu0 %v3817_v25 }
 0x136   : > { %vm1061_vm11 = vcmp.eq.s32.totalorder %v1037_v26, %v4380_v41  ;;  %3820 = vmatpush3.bf16.msra.mxu0 %v3817_v25 }
 0x137   : > { %v3046_v27 = vsel %vm1061_vm11, 1.0, %v4050_v44  ;;  %vm5291_vm11 = vmpackc.low %vm2634_vm10, %vm2634_vm10 }
 0x138   : > { %3513 = vmatmul.mubr.msk.f32.gmra.mrb[26].mxu0 %vm515_vm1, %v3046_v27 }
 0x13a   : > { %v1326_v29 = vpop.permute.xlu1 %1325 }
 0x13b   : > { %vm1350_vm12 = vcmp.eq.s32.totalorder %v1326_v29, %v4380_v41 }
 0x13c   : > { %v3079_v31 = vsel %vm1350_vm12, 1.0, %v4050_v44  ;;  %vm5316_vm12 = vmpackc.low %vm1845_vm8, %vm1845_vm8 }
 0x13d   : > { %3563 = vmatmul.mubr.msk.f32.gmra.mrb[26].mxu1 %vm515_vm1, %v3079_v31 }
 0x13f   : > { %v1040_v32 = vpop.permute.xlu1 %1039 }
 0x140   : > { %vm1062_vm15 = vcmp.eq.s32.totalorder %v1040_v32, %v4380_v41 }
 0x141   : > { %v3047_v34 = vsel %vm1062_vm15, 1.0, %v4050_v44 }
 0x142   : > { %3515 = vmatprep.mubr.msk.f32.mxu0 %vm515_vm1, %v3047_v34 }
 0x143   : > { %3516 = vmatmul.mubr.msk.f32.gmra.mrb[28].mxu0 %vm515_vm1, %v3048_v33 }
 0x144   : > { %v1329_v37 = vpop.permute.xlu1 %1328  ;;  %3518 = vmatprep.mubr.msk.f32.mxu0 %vm515_vm1, %v3049_v35 }
 0x145   : > { %vm1351_vm0 = vcmp.eq.s32.totalorder %v1329_v37, %v4380_v41 }
 0x146   : > { %v3080_v38 = vsel %vm1351_vm0, 1.0, %v4050_v44 }
 0x147   : > { %3565 = vmatprep.mubr.msk.f32.mxu1 %vm515_vm1, %v3080_v38 }
 0x148   : > { %v1332_v39 = vpop.permute.xlu1 %1331 }
 0x149   : > { %vm1352_vm3 = vcmp.eq.s32.totalorder %v1332_v39, %v4380_v41 }
 0x14a   : > { %v3081_v43 = vsel %vm1352_vm3, 1.0, %v4050_v44 }
 0x14b   : > { %3566 = vmatmul.mubr.msk.f32.gmra.mrb[28].mxu1 %vm515_vm1, %v3081_v43 }
 0x14c   : > { %3568 = vmatprep.mubr.msk.f32.mxu1 %vm515_vm1, %v3082_v42 }
 0x14d   : > { %v1049_v45 = vpop.permute.xlu1 %1048 }
 0x14e   : > { %vm1065_vm4 = vcmp.eq.s32.totalorder %v1049_v45, %v4380_v41 }
 0x14f   : > { %v3050_v46 = vsel %vm1065_vm4, 1.0, %v4050_v44 }
 0x150   : > { %3519 = vmatmul.mubr.msk.f32.gmra.mrb[30].mxu0 %vm515_vm1, %v3050_v46 }
 0x152   : > { %v1338_v47 = vpop.permute.xlu1 %1337 }
 0x153   : > { %vm1354_vm5 = vcmp.eq.s32.totalorder %v1338_v47, %v4380_v41 }
 0x154   : > { %v3083_v48 = vsel %vm1354_vm5, 1.0, %v4050_v44 }
 0x155   : > { %3569 = vmatmul.mubr.msk.f32.gmra.mrb[30].mxu1 %vm515_vm1, %v3083_v48  ;;  %vm1772_vm1 = vcmask 130048  }
 0x176   : > { %v3449_v49 = vpop.f32.mrb[0].mxu1 }
 0x177   : > { %v923_v50 = vpop.f32.mrb[1].mxu1  ;;  %1598 = vrot.lane.b32.xlu0 %v3449_v49, %s4051_s17  ;;  %v4633_v51 = vpop.f32.mrb[0].mxu0 }
 0x178   : > { %1596 = vrot.lane.b32.xlu1 %v923_v50, %s4051_s17  ;;  %v4636_v52 = vpop.f32.mrb[1].mxu0 }
 0x17b   : > { %v4638_v53 = vpop.f32.mrb[2].mxu0 }
 0x17c   : > { %v4640_v54 = vpop.f32.mrb[3].mxu0 }
 0x186   : > { %v4642_v41 = vpop.f32.mrb[4].mxu0 }
 0x187   : > { %v4644_v55 = vpop.f32.mrb[5].mxu0 }
 0x193   : > { %v4646_v56 = vpop.f32.mrb[6].mxu0 }
 0x194   : > { %v4648_v57 = vpop.f32.mrb[7].mxu0 }
 0x198   : > { %v3452_v58 = vpop.f32.mrb[2].mxu1 }
 0x199   : > { %1602 = vrot.lane.b32.xlu0 %v3452_v58, %s4051_s17  ;;  %v933_v59 = vpop.f32.mrb[3].mxu1 }
 0x19a   : > { %1600 = vrot.lane.b32.xlu1 %v933_v59, %s4051_s17 }
 0x19c   : > { %v3455_v60 = vpop.f32.mrb[4].mxu1 }
 0x19d   : > { %1606 = vrot.lane.b32.xlu0 %v3455_v60, %s4051_s17  ;;  %v943_v61 = vpop.f32.mrb[5].mxu1 }
 0x19e   : > { %1604 = vrot.lane.b32.xlu1 %v943_v61, %s4051_s17  ;;  %v4654_v62 = vpop.f32.mrb[8].mxu0 }
 0x19f   : > { %v4656_v63 = vpop.f32.mrb[9].mxu0 }
 0x1a0   : > { %v3458_v0 = vpop.f32.mrb[6].mxu1 }
 0x1a1   : > { %1610 = vrot.lane.b32.xlu0 %v3458_v0, %s4051_s17  ;;  %v953_v1 = vpop.f32.mrb[7].mxu1 }
 0x1a2   : > { %1608 = vrot.lane.b32.xlu1 %v953_v1, %s4051_s17 }
 0x1a6   : > { %v3461_v2 = vpop.f32.mrb[8].mxu1 }
 0x1a7   : > { %1614 = vrot.lane.b32.xlu0 %v3461_v2, %s4051_s17  ;;  %v963_v3 = vpop.f32.mrb[9].mxu1 }
 0x1a8   : > { %1612 = vrot.lane.b32.xlu1 %v963_v3, %s4051_s17 }
 0x1ab   : > { %v4662_v4 = vpop.f32.mrb[10].mxu0 }
 0x1ac   : > { %v4664_v5 = vpop.f32.mrb[11].mxu0 }
 0x1b0   : > { %v3464_v6 = vpop.f32.mrb[10].mxu1 }
 0x1b1   : > { %1618 = vrot.lane.b32.xlu0 %v3464_v6, %s4051_s17  ;;  %v973_v7 = vpop.f32.mrb[11].mxu1 }
 0x1b2   : > { %1616 = vrot.lane.b32.xlu1 %v973_v7, %s4051_s17 }
 0x1b6   : > { %v4668_v8 = vpop.f32.mrb[12].mxu0 }
 0x1b7   : > { %v4670_v9 = vpop.f32.mrb[13].mxu0 }
 0x1be   : > { %v3467_v15 = vpop.f32.mrb[12].mxu1 }
 0x1bf   : > { %1622 = vrot.lane.b32.xlu0 %v3467_v15, %s4051_s17  ;;  %v983_v17 = vpop.f32.mrb[13].mxu1 }
 0x1c0   : > { %1620 = vrot.lane.b32.xlu1 %v983_v17, %s4051_s17 }
 0x1c3   : > { %v4692_v20 = vpop.f32.mrb[14].mxu0 }
 0x1c4   : > { %v4700_v24 = vpop.f32.mrb[15].mxu0 }
 0x1c8   : > { %v3470_v26 = vpop.f32.mrb[14].mxu1 }
 0x1c9   : > { %1626 = vrot.lane.b32.xlu0 %v3470_v26, %s4051_s17  ;;  %v993_v27 = vpop.f32.mrb[15].mxu1 }
 0x1ca   : > { %1624 = vrot.lane.b32.xlu1 %v993_v27, %s4051_s17 }
 0x1ce   : > { %v3499_v28 = vpop.f32.mrb[16].mxu0 }
 0x1cf   : > { %1662 = vrot.lane.b32.xlu0 %v3499_v28, %s4052_s18  ;;  %v1212_v29 = vpop.f32.mrb[17].mxu0 }
 0x1d0   : > { %1660 = vrot.lane.b32.xlu1 %v1212_v29, %s4052_s18 }
 0x1d6   : > { %v3549_v30 = vpop.f32.mrb[16].mxu1 }
 0x1d7   : > { %v1501_v31 = vpop.f32.mrb[17].mxu1  ;;  %1726 = vrot.lane.b32.xlu0 %v3549_v30, %s4053_s10 }
 0x1d8   : > { %1724 = vrot.lane.b32.xlu1 %v1501_v31, %s4053_s10 }
 0x1db   : > { %v3502_v32 = vpop.f32.mrb[18].mxu0 }
 0x1dc   : > { %1666 = vrot.lane.b32.xlu0 %v3502_v32, %s4052_s18  ;;  %v1222_v33 = vpop.f32.mrb[19].mxu0 }
 0x1dd   : > { %1664 = vrot.lane.b32.xlu1 %v1222_v33, %s4052_s18 }
 0x1e0   : > { %v3552_v34 = vpop.f32.mrb[18].mxu1 }
 0x1e1   : > { %1730 = vrot.lane.b32.xlu0 %v3552_v34, %s4053_s10  ;;  %v1511_v35 = vpop.f32.mrb[19].mxu1 }
 0x1e2   : > { %1728 = vrot.lane.b32.xlu1 %v1511_v35, %s4053_s10 }
 0x1e6   : > { %v3505_v36 = vpop.f32.mrb[20].mxu0 }
 0x1e7   : > { %1670 = vrot.lane.b32.xlu0 %v3505_v36, %s4052_s18  ;;  %v1232_v37 = vpop.f32.mrb[21].mxu0 }
 0x1e8   : > { %1668 = vrot.lane.b32.xlu1 %v1232_v37, %s4052_s18 }
 0x1e9   : > { %v1599_v50 = vpop.permute.xlu0 %1598 }
 0x1ea   : > { %v1597_v59 = vpop.permute.xlu1 %1596 }
 0x1ee   : > { %v3555_v38 = vpop.f32.mrb[20].mxu1 }
 0x1ef   : > { %v1521_v39 = vpop.f32.mrb[21].mxu1  ;;  %1734 = vrot.lane.b32.xlu0 %v3555_v38, %s4053_s10 }
 0x1f0   : > { %1732 = vrot.lane.b32.xlu1 %v1521_v39, %s4053_s10 }
 0x1f3   : > { %v3508_v42 = vpop.f32.mrb[22].mxu0 }
 0x1f4   : > { %1674 = vrot.lane.b32.xlu0 %v3508_v42, %s4052_s18  ;;  %v1242_v43 = vpop.f32.mrb[23].mxu0 }
 0x1f5   : > { %1672 = vrot.lane.b32.xlu1 %v1242_v43, %s4052_s18 }
 0x1f8   : > { %v3558_v45 = vpop.f32.mrb[22].mxu1 }
 0x1f9   : > { %v1531_v46 = vpop.f32.mrb[23].mxu1  ;;  %1738 = vrot.lane.b32.xlu0 %v3558_v45, %s4053_s10 }
 0x1fa   : > { %1736 = vrot.lane.b32.xlu1 %v1531_v46, %s4053_s10 }
 0x1fe   : > { %v3511_v47 = vpop.f32.mrb[24].mxu0 }
 0x1ff   : > { %1678 = vrot.lane.b32.xlu0 %v3511_v47, %s4052_s18  ;;  %v1252_v48 = vpop.f32.mrb[25].mxu0 }
 0x200   : > { %1676 = vrot.lane.b32.xlu1 %v1252_v48, %s4052_s18 }
 0x206   : > { %v3561_v49 = vpop.f32.mrb[24].mxu1 }
 0x207   : > { %v1541_v58 = vpop.f32.mrb[25].mxu1  ;;  %1742 = vrot.lane.b32.xlu0 %v3561_v49, %s4053_s10 }
 0x208   : > { %1740 = vrot.lane.b32.xlu1 %v1541_v58, %s4053_s10 }
 0x20b   : > { %v3514_v60 = vpop.f32.mrb[26].mxu0  ;;  %v4724_v61 = vpop.permute.xlu0 %1602 }
 0x20c   : > { %v4726_v0 = vpop.permute.xlu1 %1600  ;;  %1682 = vrot.lane.b32.xlu0 %v3514_v60, %s4052_s18  ;;  %v1262_v1 = vpop.f32.mrb[27].mxu0  ;;  %v1776_v48 = vsel %vm1772_vm1, %v4638_v53, %v4724_v61 }
 0x20d   : > { %1680 = vrot.lane.b32.xlu1 %v1262_v1, %s4052_s18  ;;  %v1775_v49 = vsel %vm1772_vm1, %v4640_v54, %v4726_v0 }
 0x20f   : > { %v4730_v2 = vpop.permute.xlu0 %1606 }
 0x210   : > { %v4732_v3 = vpop.permute.xlu1 %1604  ;;  %v3564_v6 = vpop.f32.mrb[26].mxu1 }
 0x211   : > { %1746 = vrot.lane.b32.xlu0 %v3564_v6, %s4053_s10  ;;  %v1551_v7 = vpop.f32.mrb[27].mxu1 }
 0x212   : > { %1744 = vrot.lane.b32.xlu1 %v1551_v7, %s4053_s10 }
 0x213   : > { %v4736_v10 = vpop.permute.xlu0 %1610 }
 0x214   : > { %v4738_v11 = vpop.permute.xlu1 %1608 }
 0x216   : > { %v3517_v12 = vpop.f32.mrb[28].mxu0 }
 0x217   : > { %1686 = vrot.lane.b32.xlu0 %v3517_v12, %s4052_s18  ;;  %v1272_v13 = vpop.f32.mrb[29].mxu0 }
 0x218   : > { %1684 = vrot.lane.b32.xlu1 %v1272_v13, %s4052_s18  ;;  %v1778_v13 = vsel %vm1772_vm1, %v4642_v41, %v4730_v2 }
 0x219   : > { %v1615_v14 = vpop.permute.xlu0 %1614 }
 0x21a   : > { %v4744_v15 = vsel %vm1772_vm1, %v4654_v62, %v1615_v14  ;;  %v1613_v16 = vpop.permute.xlu1 %1612  ;;  %v1777_v14 = vsel %vm1772_vm1, %v4644_v55, %v4732_v3 }
 0x21b   : > { %v4748_v17 = vsel %vm1772_vm1, %v4656_v63, %v1613_v16 }
 0x21e   : > { %v3567_v18 = vpop.f32.mrb[28].mxu1 }
 0x21f   : > { %v1561_v19 = vpop.f32.mrb[29].mxu1  ;;  %1750 = vrot.lane.b32.xlu0 %v3567_v18, %s4053_s10 }
 0x220   : > { %1748 = vrot.lane.b32.xlu1 %v1561_v19, %s4053_s10 }
 0x223   : > { %v3520_v21 = vpop.f32.mrb[30].mxu0  ;;  %v1619_v22 = vpop.permute.xlu0 %1618 }
 0x224   : > { %v4754_v23 = vsel %vm1772_vm1, %v4662_v4, %v1619_v22  ;;  %v1617_v25 = vpop.permute.xlu1 %1616  ;;  %1690 = vrot.lane.b32.xlu0 %v3520_v21, %s4052_s18  ;;  %v1282_v62 = vpop.f32.mrb[31].mxu0 }
 0x225   : > { %v4759_v63 = vsel %vm1772_vm1, %v4664_v5, %v1617_v25  ;;  %1688 = vrot.lane.b32.xlu1 %v1282_v62, %s4052_s18  ;;  %s3982_s18 = scalar_lea.vmem %s5430_s12, 16 }
 0x226   : > { %p3983_p11 = scmp.ne.s32.totalorder %s5430_s12, %s3982_s18 }
 0x228   : > { %v3570_v26 = vpop.f32.mrb[30].mxu1  ;;  %p3984_p12 = pnand %p3983_p11, %p4155_p5 }
 0x229   : > { %1754 = vrot.lane.b32.xlu0 %v3570_v26, %s4053_s10  ;;  %v1571_v27 = vpop.f32.mrb[31].mxu1 }
 0x22a   : > { %1752 = vrot.lane.b32.xlu1 %v1571_v27, %s4053_s10  ;;  %v1780_v27 = vsel %vm1772_vm1, %v4646_v56, %v4736_v10  ;;  %p3985_p13 = pneg %p3984_p12  ;;  %s4056_s10 = smov [#allocation3]  }
 0x22b   : > { %s3986_s17 = sshll.u32 %s4056_s10, 4  ;;  %s3987_s17 = int_to_ptr.vmem [resolvable:$false] %s3986_s17 }
 0x22c   : > { %s3988_s23 = scalar_lea.vmem %s3987_s17, 32  ;;  %p3989_p0 = scmp.lt.s32.totalorder %s5430_s12, %s3987_s17 }
 0x22d   : > { %p3990_p1 = scmp.lt.s32.totalorder %s3988_s23, %s3982_s18 }
 0x22f   : > { %p3991_p2 = por %p3990_p1, %p3989_p0 }
 0x231   : > { %v1623_v28 = vpop.permute.xlu0 %1622  ;;  %p3992_p3 = pnand %p3991_p2, %p3985_p13 }
 0x232   : > { %v4766_v4 = vsel %vm1772_vm1, %v4668_v8, %v1623_v28  ;;  %v1621_v29 = vpop.permute.xlu1 %1620  ;;  %v1774_v8 = vsel %vm1772_vm1, %v4633_v51, %v1599_v50  ;;  %v1779_v28 = vsel %vm1772_vm1, %v4648_v57, %v4738_v11 }
 0x233   : > { %v4770_v30 = vsel %vm1772_vm1, %v4670_v9, %v1621_v29  ;;  %v4785_v9 = vld [vmem:[%s5472_s2] ss:$0 sm:$0xff] }
 0x23b   : > { %v1627_v5 = vpop.permute.xlu0 %1626 }
 0x23c   : > { %v4774_v31 = vsel %vm1772_vm1, %v4692_v20, %v1627_v5  ;;  %v1625_v32 = vpop.permute.xlu1 %1624  ;;  %v1773_v20 = vsel %vm1772_vm1, %v4636_v52, %v1597_v59 }
 0x23d   : > { %v4778_v33 = vsel %vm1772_vm1, %v4700_v24, %v1625_v32 }
 0x241   : > { %v1663_v34 = vpop.permute.xlu0 %1662 }
 0x242   : > { %v1661_v35 = vpop.permute.xlu1 %1660  ;;  %v1791_v36 = vsel %vm1789_vm6, %v1774_v8, %v1663_v34 }
 0x243   : > { %v1790_v24 = vsel %vm1789_vm6, %v1773_v20, %v1661_v35 }
 0x249   : > { %v1727_v37 = vpop.permute.xlu0 %1726 }
 0x24a   : > { %v4792_v38 = vsel %vm1806_vm7, %v1791_v36, %v1727_v37  ;;  %v1725_v39 = vpop.permute.xlu1 %1724 }
 0x24b   : > { %v4795_v51 = vsel %vm1806_vm7, %v1790_v24, %v1725_v39  ;;  %v1830_v42 = vmul.f32 %v4785_v9, %v4792_v38 }
 0x24c   : > { %3587 = vmatprep.mubr.msk.f32.mxu0 %vm1845_vm8, %v4795_v51  ;;  %v1829_v52 = vmul.f32 %v4785_v9, %v4795_v51 }
 0x24d   : > { %3588 = vmatmul.mubr.msk.f32.vlgmr.msra.gmra.mrb[32].mxu0 %vm1845_vm8, %v4792_v38  ;;  %v1849_v43 = vsel %vm1845_vm8, %v1830_v42, 0.0 }
 0x24e   : > { %1850 = vadd.xlane.f32.xlu0 %v1849_v43  ;;  %v1667_v45 = vpop.permute.xlu0 %1666  ;;  %v1846_v46 = vsel %vm1845_vm8, %v1829_v52, 0.0 }
 0x24f   : > { %v1665_v47 = vpop.permute.xlu1 %1664  ;;  %1847 = vadd.xlane.f32.xlu1 %v1846_v46  ;;  %v1793_v50 = vsel %vm1789_vm6, %v1776_v48, %v1667_v45 }
 0x250   : > { %v1792_v59 = vsel %vm1789_vm6, %v1775_v49, %v1665_v47 }
 0x253   : > { %v1731_v58 = vpop.permute.xlu0 %1730 }
 0x254   : > { %v4816_v60 = vsel %vm1806_vm7, %v1793_v50, %v1731_v58  ;;  %v1729_v1 = vpop.permute.xlu1 %1728 }
 0x255   : > { %v4819_v6 = vsel %vm1806_vm7, %v1792_v59, %v1729_v1  ;;  %v1832_v7 = vmul.f32 %v4785_v9, %v4816_v60 }
 0x256   : > { %3590 = vmatprep.mubr.msk.f32.mxu0 %vm1845_vm8, %v4819_v6  ;;  %v1831_v53 = vmul.f32 %v4785_v9, %v4819_v6 }
 0x257   : > { %3591 = vmatmul.mubr.msk.f32.gmra.mrb[34].mxu0 %vm1845_vm8, %v4816_v60  ;;  %v1855_v54 = vsel %vm1845_vm8, %v1832_v7, 0.0 }
 0x258   : > { %1856 = vadd.xlane.f32.xlu1 %v1855_v54  ;;  %v1852_v61 = vsel %vm1845_vm8, %v1831_v53, 0.0 }
 0x259   : > { %1853 = vadd.xlane.f32.xlu0 %v1852_v61  ;;  %v1671_v0 = vpop.permute.xlu0 %1670 }
 0x25a   : > { %v1669_v12 = vpop.permute.xlu1 %1668  ;;  %v1795_v16 = vsel %vm1789_vm6, %v1778_v13, %v1671_v0 }
 0x25b   : > { %v1794_v19 = vsel %vm1789_vm6, %v1777_v14, %v1669_v12 }
 0x261   : > { %v1735_v18 = vpop.permute.xlu0 %1734 }
 0x262   : > { %v4840_v21 = vsel %vm1806_vm7, %v1795_v16, %v1735_v18  ;;  %v1733_v22 = vpop.permute.xlu1 %1732 }
 0x263   : > { %v4843_v25 = vsel %vm1806_vm7, %v1794_v19, %v1733_v22  ;;  %v1834_v62 = vmul.f32 %v4785_v9, %v4840_v21 }
 0x264   : > { %3593 = vmatprep.mubr.msk.f32.mxu0 %vm1845_vm8, %v4843_v25  ;;  %v1833_v41 = vmul.f32 %v4785_v9, %v4843_v25 }
 0x265   : > { %3594 = vmatmul.mubr.msk.f32.gmra.mrb[36].mxu0 %vm1845_vm8, %v4840_v21  ;;  %v1861_v55 = vsel %vm1845_vm8, %v1834_v62, 0.0 }
 0x266   : > { %1862 = vadd.xlane.f32.xlu1 %v1861_v55  ;;  %v1675_v2 = vpop.permute.xlu0 %1674  ;;  %v1858_v3 = vsel %vm1845_vm8, %v1833_v41, 0.0 }
 0x267   : > { %v1673_v26 = vpop.permute.xlu1 %1672  ;;  %1859 = vadd.xlane.f32.xlu0 %v1858_v3  ;;  %v1797_v29 = vsel %vm1789_vm6, %v1780_v27, %v1675_v2 }
 0x268   : > { %v1796_v32 = vsel %vm1789_vm6, %v1779_v28, %v1673_v26 }
 0x26b   : > { %v1739_v5 = vpop.permute.xlu0 %1738 }
 0x26c   : > { %v4864_v34 = vsel %vm1806_vm7, %v1797_v29, %v1739_v5  ;;  %v1737_v35 = vpop.permute.xlu1 %1736 }
 0x26d   : > { %v4867_v8 = vsel %vm1806_vm7, %v1796_v32, %v1737_v35  ;;  %v1836_v20 = vmul.f32 %v4785_v9, %v4864_v34  ;;  %v2414_v35 = vld [vmem:[%s5476_s6] sm:$0xff] }
 0x26e   : > { %3596 = vmatprep.mubr.msk.f32.mxu0 %vm1845_vm8, %v4867_v8  ;;  %v1835_v56 = vmul.f32 %v4785_v9, %v4867_v8 }
 0x26f   : > { %3597 = vmatmul.mubr.msk.f32.gmra.mrb[38].mxu0 %vm1845_vm8, %v4864_v34  ;;  %v1867_v57 = vsel %vm1845_vm8, %v1836_v20, 0.0  ;;  %v2415_v20 = vld [vmem:[%s5476_s6 + $0x8] sm:$0xff] }
 0x270   : > { %1868 = vadd.xlane.f32.xlu1 %v1867_v57  ;;  %v1864_v10 = vsel %vm1845_vm8, %v1835_v56, 0.0  ;;  %v3821_v56 = vpack.c.bf16 %v2415_v20, %v2414_v35 }
 0x271   : > { %1865 = vadd.xlane.f32.xlu0 %v1864_v10  ;;  %v1679_v11 = vpop.permute.xlu0 %1678 }
 0x272   : > { %v1677_v36 = vpop.permute.xlu1 %1676  ;;  %v1799_v37 = vsel %vm1789_vm6, %v4744_v15, %v1679_v11  ;;  %3822 = vmatprep.subr.bf16.mxu1 %v3821_v56 }
 0x273   : > { %v1798_v39 = vsel %vm1789_vm6, %v4748_v17, %v1677_v36  ;;  %3824 = vmatpush3.bf16.msra.mxu1 %v3821_v56 }
 0x279   : > { %v1743_v24 = vpop.permute.xlu0 %1742 }
 0x27a   : > { %v4884_v42 = vsel %vm1806_vm7, %v1799_v37, %v1743_v24  ;;  %v1741_v52 = vpop.permute.xlu1 %1740 }
 0x27b   : > { %v4887_v43 = vsel %vm1806_vm7, %v1798_v39, %v1741_v52  ;;  %v1838_v45 = vmul.f32 %v4785_v9, %v4884_v42  ;;  %v4977_v39 = vld [vmem:[%s5472_s2 + $0x1] ss:$0 sm:$0xff] }
 0x27c   : > { %3599 = vmatprep.mubr.msk.f32.mxu0 %vm1845_vm8, %v4887_v43  ;;  %v1837_v15 = vmul.f32 %v4785_v9, %v4887_v43 }
 0x27d   : > { %3600 = vmatmul.mubr.msk.f32.gmra.mrb[40].mxu0 %vm1845_vm8, %v4884_v42  ;;  %v1873_v17 = vsel %vm1845_vm8, %v1838_v45, 0.0 }
 0x27e   : > { %1874 = vadd.xlane.f32.xlu1 %v1873_v17  ;;  %v1683_v46 = vpop.permute.xlu0 %1682  ;;  %v1870_v47 = vsel %vm1845_vm8, %v1837_v15, 0.0 }
 0x27f   : > { %v1681_v48 = vpop.permute.xlu1 %1680  ;;  %1871 = vadd.xlane.f32.xlu0 %v1870_v47  ;;  %v1801_v49 = vsel %vm1789_vm6, %v4754_v23, %v1683_v46 }
 0x280   : > { %v1800_v58 = vsel %vm1789_vm6, %v4759_v63, %v1681_v48 }
 0x283   : > { %v1747_v50 = vpop.permute.xlu0 %1746 }
 0x284   : > { %v4904_v59 = vsel %vm1806_vm7, %v1801_v49, %v1747_v50  ;;  %v1745_v1 = vpop.permute.xlu1 %1744 }
 0x285   : > { %v4907_v7 = vsel %vm1806_vm7, %v1800_v58, %v1745_v1  ;;  %v1840_v53 = vmul.f32 %v4785_v9, %v4904_v59 }
 0x286   : > { %3602 = vmatprep.mubr.msk.f32.mxu0 %vm1845_vm8, %v4907_v7  ;;  %v1839_v23 = vmul.f32 %v4785_v9, %v4907_v7 }
 0x287   : > { %3603 = vmatmul.mubr.msk.f32.gmra.mrb[42].mxu0 %vm1845_vm8, %v4904_v59  ;;  %v1879_v63 = vsel %vm1845_vm8, %v1840_v53, 0.0 }
 0x288   : > { %1880 = vadd.xlane.f32.xlu1 %v1879_v63  ;;  %v1876_v54 = vsel %vm1845_vm8, %v1839_v23, 0.0 }
 0x289   : > { %1877 = vadd.xlane.f32.xlu0 %v1876_v54  ;;  %v1687_v61 = vpop.permute.xlu0 %1686 }
 0x28a   : > { %v1685_v0 = vpop.permute.xlu1 %1684  ;;  %v1803_v12 = vsel %vm1789_vm6, %v4766_v4, %v1687_v61 }
 0x28b   : > { %v1802_v14 = vsel %vm1789_vm6, %v4770_v30, %v1685_v0 }
 0x291   : > { %v1751_v13 = vpop.permute.xlu0 %1750 }
 0x292   : > { %v4924_v16 = vsel %vm1806_vm7, %v1803_v12, %v1751_v13  ;;  %v1749_v18 = vpop.permute.xlu1 %1748 }
 0x293   : > { %v4927_v19 = vsel %vm1806_vm7, %v1802_v14, %v1749_v18  ;;  %v1842_v22 = vmul.f32 %v4785_v9, %v4924_v16 }
 0x294   : > { %3605 = vmatprep.mubr.msk.f32.mxu0 %vm1845_vm8, %v4927_v19  ;;  %v1841_v4 = vmul.f32 %v4785_v9, %v4927_v19 }
 0x295   : > { %3606 = vmatmul.mubr.msk.f32.gmra.mrb[44].mxu0 %vm1845_vm8, %v4924_v16  ;;  %v1885_v30 = vsel %vm1845_vm8, %v1842_v22, 0.0 }
 0x296   : > { %1886 = vadd.xlane.f32.xlu1 %v1885_v30  ;;  %v1691_v62 = vpop.permute.xlu0 %1690  ;;  %v1882_v41 = vsel %vm1845_vm8, %v1841_v4, 0.0 }
 0x297   : > { %v1689_v55 = vpop.permute.xlu1 %1688  ;;  %1883 = vadd.xlane.f32.xlu0 %v1882_v41  ;;  %v1805_v2 = vsel %vm1789_vm6, %v4774_v31, %v1691_v62 }
 0x298   : > { %v1804_v26 = vsel %vm1789_vm6, %v4778_v33, %v1689_v55 }
 0x29b   : > { %v1755_v3 = vpop.permute.xlu0 %1754 }
 0x29c   : > { %v4944_v27 = vsel %vm1806_vm7, %v1805_v2, %v1755_v3  ;;  %v1753_v28 = vpop.permute.xlu1 %1752 }
 0x29d   : > { %v4947_v29 = vsel %vm1806_vm7, %v1804_v26, %v1753_v28  ;;  %v1844_v5 = vmul.f32 %v4785_v9, %v4944_v27 }
 0x29e   : > { %3608 = vmatprep.mubr.msk.f32.mxu0 %vm1845_vm8, %v4947_v29  ;;  %v1843_v31 = vmul.f32 %v4785_v9, %v4947_v29  ;;  %v4968_v9 = vld [vmem:[%s5473_s3] ss:$0 sm:$0xff] }
 0x29f   : > { %3609 = vmatmul.mubr.msk.f32.gmra.mrb[46].mxu0 %vm1845_vm8, %v4944_v27  ;;  %v1891_v33 = vsel %vm1845_vm8, %v1844_v5, 0.0 }
 0x2a0   : > { %1892 = vadd.xlane.f32.xlu1 %v1891_v33  ;;  %v1888_v32 = vsel %vm1845_vm8, %v1843_v31, 0.0  ;;  %3671 = vmatprep.mubr.msk.f32.mxu0 %vm4055_vm9, %v4050_v44 }
 0x2a1   : > { %1889 = vadd.xlane.f32.xlu0 %v1888_v32 }
 0x2db   : > { %v1851_v57 = vpop.xlane.xlu0 %1850 }
 0x2dc   : > { %v1895_v10 = vmul.f32 %v1851_v57, %v4792_v38  ;;  %v1848_v11 = vpop.xlane.xlu1 %1847 }
 0x2dd   : > { %v1894_v36 = vmul.f32 %v1848_v11, %v4795_v51 }
 0x2de   : > { %v1915_v37 = vadd.f32 %v4968_v9, %v1895_v10 }
 0x2df   : > { %v1914_v24 = vadd.f32 %v4968_v9, %v1894_v36 }
 0x2e0   : > { %v4980_v52 = vadd.f32 %v1915_v37, %v4792_v38 }
 0x2e1   : > { %v4983_v45 = vadd.f32 %v1914_v24, %v4795_v51 }
 0x2e2   : > { %v1953_v15 = vmul.f32 %v4977_v39, %v4980_v52 }
 0x2e3   : > { %v1952_v17 = vmul.f32 %v4977_v39, %v4983_v45 }
 0x2e4   : > { %v1971_v46 = vsel %vm1845_vm8, %v1953_v15, 0.0 }
 0x2e5   : > { %v1857_v47 = vpop.xlane.xlu1 %1856  ;;  %1972 = vadd.xlane.f32.xlu1 %v1971_v46  ;;  %v1968_v48 = vsel %vm1845_vm8, %v1952_v17, 0.0 }
 0x2e6   : > { %v1897_v49 = vmul.f32 %v1857_v47, %v4816_v60  ;;  %1969 = vadd.xlane.f32.xlu0 %v1968_v48  ;;  %v1854_v50 = vpop.xlane.xlu0 %1853 }
 0x2e7   : > { %v1896_v58 = vmul.f32 %v1854_v50, %v4819_v6 }
 0x2e8   : > { %v1917_v1 = vadd.f32 %v4968_v9, %v1897_v49 }
 0x2e9   : > { %v1916_v53 = vadd.f32 %v4968_v9, %v1896_v58 }
 0x2ea   : > { %v4996_v23 = vadd.f32 %v1917_v1, %v4816_v60 }
 0x2eb   : > { %v4999_v63 = vadd.f32 %v1916_v53, %v4819_v6 }
 0x2ec   : > { %v1955_v54 = vmul.f32 %v4977_v39, %v4996_v23 }
 0x2ed   : > { %v1954_v61 = vmul.f32 %v4977_v39, %v4999_v63 }
 0x2ee   : > { %v1977_v0 = vsel %vm1845_vm8, %v1955_v54, 0.0 }
 0x2ef   : > { %1978 = vadd.xlane.f32.xlu1 %v1977_v0  ;;  %v1974_v12 = vsel %vm1845_vm8, %v1954_v61, 0.0 }
 0x2f0   : > { %1975 = vadd.xlane.f32.xlu0 %v1974_v12 }
 0x2f3   : > { %v1863_v13 = vpop.xlane.xlu1 %1862 }
 0x2f4   : > { %v1899_v14 = vmul.f32 %v1863_v13, %v4840_v21  ;;  %v1860_v18 = vpop.xlane.xlu0 %1859 }
 0x2f5   : > { %v1898_v22 = vmul.f32 %v1860_v18, %v4843_v25 }
 0x2f6   : > { %v1919_v4 = vadd.f32 %v4968_v9, %v1899_v14 }
 0x2f7   : > { %v1918_v30 = vadd.f32 %v4968_v9, %v1898_v22 }
 0x2f8   : > { %v5012_v62 = vadd.f32 %v1919_v4, %v4840_v21 }
 0x2f9   : > { %v5015_v41 = vadd.f32 %v1918_v30, %v4843_v25 }
 0x2fa   : > { %v1957_v55 = vmul.f32 %v4977_v39, %v5012_v62 }
 0x2fb   : > { %v1956_v2 = vmul.f32 %v4977_v39, %v5015_v41 }
 0x2fc   : > { %v1983_v3 = vsel %vm1845_vm8, %v1957_v55, 0.0 }
 0x2fd   : > { %v1869_v26 = vpop.xlane.xlu1 %1868  ;;  %1984 = vadd.xlane.f32.xlu1 %v1983_v3  ;;  %v1980_v28 = vsel %vm1845_vm8, %v1956_v2, 0.0  ;;  %v5073_v2 = vld [vmem:[%s5475_s5] ss:$0 sm:$0xff] }
 0x2fe   : > { %v1901_v5 = vmul.f32 %v1869_v26, %v4864_v34  ;;  %1981 = vadd.xlane.f32.xlu0 %v1980_v28  ;;  %v1866_v31 = vpop.xlane.xlu0 %1865 }
 0x2ff   : > { %v1900_v33 = vmul.f32 %v1866_v31, %v4867_v8 }
 0x300   : > { %v1921_v32 = vadd.f32 %v4968_v9, %v1901_v5 }
 0x301   : > { %v1920_v35 = vadd.f32 %v4968_v9, %v1900_v33 }
 0x302   : > { %v5028_v20 = vadd.f32 %v1921_v32, %v4864_v34 }
 0x303   : > { %v5031_v56 = vadd.f32 %v1920_v35, %v4867_v8 }
 0x304   : > { %v1959_v57 = vmul.f32 %v4977_v39, %v5028_v20 }
 0x305   : > { %v1958_v10 = vmul.f32 %v4977_v39, %v5031_v56 }
 0x306   : > { %v1989_v11 = vsel %vm1845_vm8, %v1959_v57, 0.0 }
 0x307   : > { %1990 = vadd.xlane.f32.xlu1 %v1989_v11  ;;  %v1986_v36 = vsel %vm1845_vm8, %v1958_v10, 0.0 }
 0x308   : > { %1987 = vadd.xlane.f32.xlu0 %v1986_v36 }
 0x30b   : > { %v1875_v37 = vpop.xlane.xlu1 %1874 }
 0x30c   : > { %v1903_v24 = vmul.f32 %v1875_v37, %v4884_v42  ;;  %v1872_v15 = vpop.xlane.xlu0 %1871 }
 0x30d   : > { %v1902_v17 = vmul.f32 %v1872_v15, %v4887_v43 }
 0x30e   : > { %v1923_v46 = vadd.f32 %v4968_v9, %v1903_v24 }
 0x30f   : > { %v1922_v47 = vadd.f32 %v4968_v9, %v1902_v17 }
 0x310   : > { %v5044_v48 = vadd.f32 %v1923_v46, %v4884_v42 }
 0x311   : > { %v5047_v49 = vadd.f32 %v1922_v47, %v4887_v43 }
 0x312   : > { %v1961_v50 = vmul.f32 %v4977_v39, %v5044_v48 }
 0x313   : > { %v1960_v58 = vmul.f32 %v4977_v39, %v5047_v49 }
 0x314   : > { %v1995_v1 = vsel %vm1845_vm8, %v1961_v50, 0.0 }
 0x315   : > { %v1881_v53 = vpop.xlane.xlu1 %1880  ;;  %1996 = vadd.xlane.f32.xlu1 %v1995_v1  ;;  %v1992_v54 = vsel %vm1845_vm8, %v1960_v58, 0.0 }
 0x316   : > { %v1905_v61 = vmul.f32 %v1881_v53, %v4904_v59  ;;  %1993 = vadd.xlane.f32.xlu0 %v1992_v54  ;;  %v1878_v0 = vpop.xlane.xlu0 %1877 }
 0x317   : > { %v1904_v12 = vmul.f32 %v1878_v0, %v4907_v7 }
 0x318   : > { %v1925_v13 = vadd.f32 %v4968_v9, %v1905_v61 }
 0x319   : > { %v1924_v14 = vadd.f32 %v4968_v9, %v1904_v12 }
 0x31a   : > { %v5060_v18 = vadd.f32 %v1925_v13, %v4904_v59 }
 0x31b   : > { %v5063_v22 = vadd.f32 %v1924_v14, %v4907_v7 }
 0x31c   : > { %v1963_v4 = vmul.f32 %v4977_v39, %v5060_v18 }
 0x31d   : > { %v1962_v30 = vmul.f32 %v4977_v39, %v5063_v22 }
 0x31e   : > { %v2001_v55 = vsel %vm1845_vm8, %v1963_v4, 0.0 }
 0x31f   : > { %2002 = vadd.xlane.f32.xlu1 %v2001_v55  ;;  %v1998_v3 = vsel %vm1845_vm8, %v1962_v30, 0.0 }
 0x320   : > { %v3589_v26 = vpop.f32.mrb[32].mxu0  ;;  %1999 = vadd.xlane.f32.xlu0 %v1998_v3 }
 0x321   : > { %v2325_v28 = vadd.f32 %v3589_v26, %v5073_v2  ;;  %v2319_v5 = vpop.f32.mrb[33].mxu0 }
 0x322   : > { %v2320_v31 = vadd.f32 %v5073_v2, %v2319_v5 }
 0x323   : > { %v1887_v33 = vpop.xlane.xlu1 %1886  ;;  %v2399_v10 = vmax.f32 %v2325_v28, 0.0 }
 0x324   : > { %v2398_v32 = vmax.f32 %v2320_v31, 0.0  ;;  %v1907_v35 = vmul.f32 %v1887_v33, %v4924_v16  ;;  %v1884_v57 = vpop.xlane.xlu0 %1883 }
 0x325   : > { %v1906_v11 = vmul.f32 %v1884_v57, %v4927_v19 }
 0x326   : > { %v1927_v36 = vadd.f32 %v4968_v9, %v1907_v35  ;;  %3615 = vmatprep.mubr.msk.f32.mxu1 %vm1772_vm1, %v2398_v32 }
 0x327   : > { %v1926_v37 = vadd.f32 %v4968_v9, %v1906_v11  ;;  %3616 = vmatmul.mubr.msk.f32.vlgmr.msra.gmra.mrb[32].mxu1 %vm1772_vm1, %v2399_v10 }
 0x328   : > { %v5085_v24 = vadd.f32 %v1927_v36, %v4924_v16 }
 0x329   : > { %v5088_v15 = vadd.f32 %v1926_v37, %v4927_v19 }
 0x32a   : > { %v3592_v17 = vpop.f32.mrb[34].mxu0  ;;  %v1965_v46 = vmul.f32 %v4977_v39, %v5085_v24 }
 0x32b   : > { %v2335_v47 = vadd.f32 %v3592_v17, %v5073_v2  ;;  %v2329_v50 = vpop.f32.mrb[35].mxu0  ;;  %v1964_v58 = vmul.f32 %v4977_v39, %v5088_v15 }
 0x32c   : > { %v2330_v1 = vadd.f32 %v5073_v2, %v2329_v50  ;;  %v2007_v53 = vsel %vm1845_vm8, %v1965_v46, 0.0 }
 0x32d   : > { %v1893_v54 = vpop.xlane.xlu1 %1892  ;;  %2008 = vadd.xlane.f32.xlu1 %v2007_v53  ;;  %v2004_v61 = vsel %vm1845_vm8, %v1964_v58, 0.0  ;;  %v2401_v14 = vmax.f32 %v2335_v47, 0.0 }
 0x32e   : > { %v2400_v0 = vmax.f32 %v2330_v1, 0.0  ;;  %v1909_v12 = vmul.f32 %v1893_v54, %v4944_v27  ;;  %2005 = vadd.xlane.f32.xlu0 %v2004_v61  ;;  %v1890_v13 = vpop.xlane.xlu0 %1889 }
 0x32f   : > { %v1908_v4 = vmul.f32 %v1890_v13, %v4947_v29 }
 0x330   : > { %v1929_v30 = vadd.f32 %v4968_v9, %v1909_v12  ;;  %3618 = vmatprep.mubr.msk.f32.mxu1 %vm1772_vm1, %v2400_v0 }
 0x331   : > { %v1928_v55 = vadd.f32 %v4968_v9, %v1908_v4  ;;  %3619 = vmatmul.mubr.msk.f32.gmra.mrb[34].mxu1 %vm1772_vm1, %v2401_v14 }
 0x332   : > { %v5105_v3 = vadd.f32 %v1929_v30, %v4944_v27 }
 0x333   : > { %v5108_v26 = vadd.f32 %v1928_v55, %v4947_v29 }
 0x334   : > { %v1967_v28 = vmul.f32 %v4977_v39, %v5105_v3 }
 0x335   : > { %v1966_v5 = vmul.f32 %v4977_v39, %v5108_v26 }
 0x336   : > { %v2013_v31 = vsel %vm1845_vm8, %v1967_v28, 0.0 }
 0x337   : > { %2014 = vadd.xlane.f32.xlu1 %v2013_v31  ;;  %v2010_v33 = vsel %vm1845_vm8, %v1966_v5, 0.0 }
 0x338   : > { %v3595_v9 = vpop.f32.mrb[36].mxu0  ;;  %2011 = vadd.xlane.f32.xlu0 %v2010_v33 }
 0x339   : > { %v2345_v32 = vadd.f32 %v3595_v9, %v5073_v2  ;;  %v2339_v35 = vpop.f32.mrb[37].mxu0 }
 0x33a   : > { %v2340_v57 = vadd.f32 %v5073_v2, %v2339_v35  ;;  %v5139_v35 = vld [vmem:[%s5473_s3 + $0x1] ss:$0 sm:$0xff] }
 0x33b   : > { %v2403_v11 = vmax.f32 %v2345_v32, 0.0 }
 0x33c   : > { %v2402_v10 = vmax.f32 %v2340_v57, 0.0 }
 0x33e   : > { %3621 = vmatprep.mubr.msk.f32.mxu1 %vm1772_vm1, %v2402_v10 }
 0x33f   : > { %3622 = vmatmul.mubr.msk.f32.gmra.mrb[36].mxu1 %vm1772_vm1, %v2403_v11 }
 0x342   : > { %v3598_v36 = vpop.f32.mrb[38].mxu0 }
 0x343   : > { %v2355_v39 = vadd.f32 %v3598_v36, %v5073_v2  ;;  %v2349_v37 = vpop.f32.mrb[39].mxu0 }
 0x344   : > { %v2350_v17 = vadd.f32 %v5073_v2, %v2349_v37 }
 0x345   : > { %v2405_v47 = vmax.f32 %v2355_v39, 0.0 }
 0x346   : > { %v2404_v46 = vmax.f32 %v2350_v17, 0.0 }
 0x348   : > { %3624 = vmatprep.mubr.msk.f32.mxu1 %vm1772_vm1, %v2404_v46 }
 0x349   : > { %3625 = vmatmul.mubr.msk.f32.gmra.mrb[38].mxu1 %vm1772_vm1, %v2405_v47 }
 0x350   : > { %v3601_v50 = vpop.f32.mrb[40].mxu0 }
 0x351   : > { %v2365_v58 = vadd.f32 %v3601_v50, %v5073_v2  ;;  %v2359_v1 = vpop.f32.mrb[41].mxu0 }
 0x352   : > { %v2360_v53 = vadd.f32 %v5073_v2, %v2359_v1 }
 0x353   : > { %v2407_v61 = vmax.f32 %v2365_v58, 0.0  ;;  %v5150_v58 = vld [vmem:[%s5472_s2 + $0x2] ss:$0 sm:$0xff] }
 0x354   : > { %v2406_v54 = vmax.f32 %v2360_v53, 0.0 }
 0x356   : > { %3627 = vmatprep.mubr.msk.f32.mxu1 %vm1772_vm1, %v2406_v54 }
 0x357   : > { %3628 = vmatmul.mubr.msk.f32.gmra.mrb[40].mxu1 %vm1772_vm1, %v2407_v61 }
 0x35a   : > { %v3604_v0 = vpop.f32.mrb[42].mxu0 }
 0x35b   : > { %v2375_v12 = vadd.f32 %v3604_v0, %v5073_v2  ;;  %v2369_v13 = vpop.f32.mrb[43].mxu0 }
 0x35c   : > { %v2370_v14 = vadd.f32 %v5073_v2, %v2369_v13 }
 0x35d   : > { %v2409_v30 = vmax.f32 %v2375_v12, 0.0 }
 0x35e   : > { %v2408_v4 = vmax.f32 %v2370_v14, 0.0 }
 0x360   : > { %3630 = vmatprep.mubr.msk.f32.mxu1 %vm1772_vm1, %v2408_v4 }
 0x361   : > { %3631 = vmatmul.mubr.msk.f32.gmra.mrb[42].mxu1 %vm1772_vm1, %v2409_v30 }
 0x368   : > { %v3607_v55 = vpop.f32.mrb[44].mxu0 }
 0x369   : > { %v2385_v28 = vadd.f32 %v3607_v55, %v5073_v2  ;;  %v2379_v5 = vpop.f32.mrb[45].mxu0 }
 0x36a   : > { %v2380_v31 = vadd.f32 %v5073_v2, %v2379_v5 }
 0x36b   : > { %v2411_v9 = vmax.f32 %v2385_v28, 0.0  ;;  %v4054_v28 = vmov 0.0|0.0  }
 0x36c   : > { %v2410_v33 = vmax.f32 %v2380_v31, 0.0  ;;  %3825 = vmatprep.subr.bf16.mxu0 %v4054_v28  ;;  %3857 = vmatprep.subr.bf16.mxu1 %v4054_v28 }
 0x36e   : > { %3633 = vmatprep.mubr.msk.f32.mxu1 %vm1772_vm1, %v2410_v33 }
 0x36f   : > { %3634 = vmatmul.mubr.msk.f32.gmra.mrb[44].mxu1 %vm1772_vm1, %v2411_v9 }
 0x372   : > { %v3610_v32 = vpop.f32.mrb[46].mxu0  ;;  %v1973_v57 = vpop.xlane.xlu1 %1972 }
 0x373   : > { %v2395_v10 = vadd.f32 %v3610_v32, %v5073_v2  ;;  %v2017_v11 = vmul.f32 %v1973_v57, %v4792_v38  ;;  %v2389_v36 = vpop.f32.mrb[47].mxu0  ;;  %v1970_v39 = vpop.xlane.xlu0 %1969 }
 0x374   : > { %v2390_v37 = vadd.f32 %v5073_v2, %v2389_v36  ;;  %v2016_v17 = vmul.f32 %v1970_v39, %v4795_v51 }
 0x375   : > { %v2037_v46 = vadd.f32 %v5139_v35, %v2017_v11  ;;  %v2413_v1 = vmax.f32 %v2395_v10, 0.0 }
 0x376   : > { %v2412_v47 = vmax.f32 %v2390_v37, 0.0  ;;  %v2036_v50 = vadd.f32 %v5139_v35, %v2016_v17 }
 0x377   : > { %v5153_v53 = vadd.f32 %v2037_v46, %v4980_v52 }
 0x378   : > { %v5156_v54 = vadd.f32 %v2036_v50, %v4983_v45  ;;  %3636 = vmatprep.mubr.msk.f32.mxu1 %vm1772_vm1, %v2412_v47 }
 0x379   : > { %3637 = vmatmul.mubr.msk.f32.gmra.mrb[46].mxu1 %vm1772_vm1, %v2413_v1  ;;  %v2075_v2 = vmul.f32 %v5150_v58, %v5153_v53 }
 0x37a   : > { %v2074_v61 = vmul.f32 %v5150_v58, %v5156_v54  ;;  %3706 = vmatprep.mubr.msk.f32.mxu1 %vm4055_vm9, %v4050_v44 }
 0x37b   : > { %v2093_v0 = vsel %vm1845_vm8, %v2075_v2, 0.0 }
 0x37c   : > { %2094 = vadd.xlane.f32.xlu1 %v2093_v0  ;;  %v1979_v12 = vpop.xlane.xlu1 %1978  ;;  %v2090_v52 = vsel %vm1845_vm8, %v2074_v61, 0.0 }
 0x37d   : > { %v2019_v13 = vmul.f32 %v1979_v12, %v4816_v60  ;;  %2091 = vadd.xlane.f32.xlu0 %v2090_v52  ;;  %v1976_v45 = vpop.xlane.xlu0 %1975 }
 0x37e   : > { %v2018_v14 = vmul.f32 %v1976_v45, %v4819_v6 }
 0x37f   : > { %v2039_v4 = vadd.f32 %v5139_v35, %v2019_v13 }
 0x380   : > { %v2038_v30 = vadd.f32 %v5139_v35, %v2018_v14 }
 0x381   : > { %v5171_v55 = vadd.f32 %v2039_v4, %v4996_v23 }
 0x382   : > { %v5176_v5 = vadd.f32 %v2038_v30, %v4999_v63 }
 0x383   : > { %v2077_v31 = vmul.f32 %v5150_v58, %v5171_v55 }
 0x384   : > { %v2076_v33 = vmul.f32 %v5150_v58, %v5176_v5 }
 0x385   : > { %v2099_v9 = vsel %vm1845_vm8, %v2077_v31, 0.0 }
 0x386   : > { %2100 = vadd.xlane.f32.xlu1 %v2099_v9  ;;  %v2096_v23 = vsel %vm1845_vm8, %v2076_v33, 0.0 }
 0x387   : > { %2097 = vadd.xlane.f32.xlu0 %v2096_v23 }
 0x38a   : > { %v1985_v32 = vpop.xlane.xlu1 %1984 }
 0x38b   : > { %v2021_v57 = vmul.f32 %v1985_v32, %v4840_v21  ;;  %v1982_v10 = vpop.xlane.xlu0 %1981 }
 0x38c   : > { %v2020_v11 = vmul.f32 %v1982_v10, %v4843_v25 }
 0x38d   : > { %v2041_v63 = vadd.f32 %v5139_v35, %v2021_v57 }
 0x38e   : > { %v2040_v36 = vadd.f32 %v5139_v35, %v2020_v11 }
 0x38f   : > { %v5189_v39 = vadd.f32 %v2041_v63, %v5012_v62 }
 0x390   : > { %v5192_v37 = vadd.f32 %v2040_v36, %v5015_v41 }
 0x391   : > { %v2079_v17 = vmul.f32 %v5150_v58, %v5189_v39 }
 0x392   : > { %v2078_v46 = vmul.f32 %v5150_v58, %v5192_v37 }
 0x393   : > { %v2105_v47 = vsel %vm1845_vm8, %v2079_v17, 0.0 }
 0x394   : > { %2106 = vadd.xlane.f32.xlu1 %v2105_v47  ;;  %v1991_v50 = vpop.xlane.xlu1 %1990  ;;  %v2102_v1 = vsel %vm1845_vm8, %v2078_v46, 0.0 }
 0x395   : > { %v2023_v2 = vmul.f32 %v1991_v50, %v4864_v34  ;;  %2103 = vadd.xlane.f32.xlu0 %v2102_v1  ;;  %v1988_v62 = vpop.xlane.xlu0 %1987 }
 0x396   : > { %v2022_v61 = vmul.f32 %v1988_v62, %v4867_v8 }
 0x397   : > { %v2043_v41 = vadd.f32 %v5139_v35, %v2023_v2 }
 0x398   : > { %v2042_v0 = vadd.f32 %v5139_v35, %v2022_v61 }
 0x399   : > { %v5205_v12 = vadd.f32 %v2043_v41, %v5028_v20 }
 0x39a   : > { %v5208_v52 = vadd.f32 %v2042_v0, %v5031_v56 }
 0x39b   : > { %v2081_v13 = vmul.f32 %v5150_v58, %v5205_v12 }
 0x39c   : > { %v2080_v45 = vmul.f32 %v5150_v58, %v5208_v52 }
 0x39d   : > { %v2111_v14 = vsel %vm1845_vm8, %v2081_v13, 0.0 }
 0x39e   : > { %2112 = vadd.xlane.f32.xlu1 %v2111_v14  ;;  %v2108_v4 = vsel %vm1845_vm8, %v2080_v45, 0.0 }
 0x39f   : > { %2109 = vadd.xlane.f32.xlu0 %v2108_v4 }
 0x3a2   : > { %v1997_v30 = vpop.xlane.xlu1 %1996 }
 0x3a3   : > { %v2025_v31 = vmul.f32 %v1997_v30, %v4884_v42  ;;  %v1994_v20 = vpop.xlane.xlu0 %1993 }
 0x3a4   : > { %v2024_v33 = vmul.f32 %v1994_v20, %v4887_v43 }
 0x3a5   : > { %v2045_v56 = vadd.f32 %v5139_v35, %v2025_v31 }
 0x3a6   : > { %v2044_v9 = vadd.f32 %v5139_v35, %v2024_v33 }
 0x3a7   : > { %v5221_v23 = vadd.f32 %v2045_v56, %v5044_v48 }
 0x3a8   : > { %v5224_v32 = vadd.f32 %v2044_v9, %v5047_v49 }
 0x3a9   : > { %v2083_v57 = vmul.f32 %v5150_v58, %v5221_v23 }
 0x3aa   : > { %v2082_v10 = vmul.f32 %v5150_v58, %v5224_v32 }
 0x3ab   : > { %v2117_v11 = vsel %vm1845_vm8, %v2083_v57, 0.0 }
 0x3ac   : > { %2118 = vadd.xlane.f32.xlu1 %v2117_v11  ;;  %v2003_v63 = vpop.xlane.xlu1 %2002  ;;  %v2114_v36 = vsel %vm1845_vm8, %v2082_v10, 0.0 }
 0x3ad   : > { %v2027_v17 = vmul.f32 %v2003_v63, %v4904_v59  ;;  %2115 = vadd.xlane.f32.xlu0 %v2114_v36  ;;  %v2000_v48 = vpop.xlane.xlu0 %1999 }
 0x3ae   : > { %v2026_v46 = vmul.f32 %v2000_v48, %v4907_v7 }
 0x3af   : > { %v2047_v49 = vadd.f32 %v5139_v35, %v2027_v17 }
 0x3b0   : > { %v2046_v47 = vadd.f32 %v5139_v35, %v2026_v46 }
 0x3b1   : > { %v5237_v50 = vadd.f32 %v2047_v49, %v5060_v18 }
 0x3b2   : > { %v5240_v1 = vadd.f32 %v2046_v47, %v5063_v22 }
 0x3b3   : > { %v2085_v2 = vmul.f32 %v5150_v58, %v5237_v50 }
 0x3b4   : > { %v2084_v62 = vmul.f32 %v5150_v58, %v5240_v1 }
 0x3b5   : > { %v2123_v61 = vsel %vm1845_vm8, %v2085_v2, 0.0 }
 0x3b6   : > { %2124 = vadd.xlane.f32.xlu1 %v2123_v61  ;;  %v2120_v41 = vsel %vm1845_vm8, %v2084_v62, 0.0 }
 0x3b7   : > { %2121 = vadd.xlane.f32.xlu0 %v2120_v41 }
 0x3ba   : > { %v2009_v0 = vpop.xlane.xlu1 %2008 }
 0x3bb   : > { %v2029_v13 = vmul.f32 %v2009_v0, %v4924_v16  ;;  %v2006_v18 = vpop.xlane.xlu0 %2005 }
 0x3bc   : > { %v2028_v45 = vmul.f32 %v2006_v18, %v4927_v19 }
 0x3bd   : > { %v2049_v22 = vadd.f32 %v5139_v35, %v2029_v13 }
 0x3be   : > { %v2048_v14 = vadd.f32 %v5139_v35, %v2028_v45 }
 0x3bf   : > { %v5253_v4 = vadd.f32 %v2049_v22, %v5085_v24 }
 0x3c0   : > { %v5256_v30 = vadd.f32 %v2048_v14, %v5088_v15 }
 0x3c1   : > { %v2087_v31 = vmul.f32 %v5150_v58, %v5253_v4 }
 0x3c2   : > { %v2086_v20 = vmul.f32 %v5150_v58, %v5256_v30 }
 0x3c3   : > { %v2129_v33 = vsel %vm1845_vm8, %v2087_v31, 0.0  ;;  %v5303_v31 = vld [vmem:[%s5473_s3 + $0x2] ss:$0 sm:$0xff] }
 0x3c4   : > { %2130 = vadd.xlane.f32.xlu1 %v2129_v33  ;;  %v2015_v56 = vpop.xlane.xlu1 %2014  ;;  %v2126_v9 = vsel %vm1845_vm8, %v2086_v20, 0.0 }
 0x3c5   : > { %v2031_v57 = vmul.f32 %v2015_v56, %v4944_v27  ;;  %2127 = vadd.xlane.f32.xlu0 %v2126_v9  ;;  %v2012_v24 = vpop.xlane.xlu0 %2011 }
 0x3c6   : > { %v2030_v10 = vmul.f32 %v2012_v24, %v4947_v29 }
 0x3c7   : > { %v2051_v15 = vadd.f32 %v5139_v35, %v2031_v57 }
 0x3c8   : > { %v2050_v11 = vadd.f32 %v5139_v35, %v2030_v10 }
 0x3c9   : > { %v5269_v63 = vadd.f32 %v2051_v15, %v5105_v3  ;;  %v2877_v3 = vld [vmem:[#allocation2] sm:$0x1] }
 0x3ca   : > { %v5272_v36 = vadd.f32 %v2050_v11, %v5108_v26  ;;  %v5285_v26 = vld [vmem:[%s5477_s7] ss:$0 sm:$0xff] }
 0x3cb   : > { %v2089_v17 = vmul.f32 %v5150_v58, %v5269_v63 }
 0x3cc   : > { %v2088_v48 = vmul.f32 %v5150_v58, %v5272_v36 }
 0x3cd   : > { %v2135_v46 = vsel %vm1845_vm8, %v2089_v17, 0.0 }
 0x3ce   : > { %2136 = vadd.xlane.f32.xlu1 %v2135_v46  ;;  %v2132_v49 = vsel %vm1845_vm8, %v2088_v48, 0.0 }
 0x3cf   : > { %2133 = vadd.xlane.f32.xlu0 %v2132_v49 }
 0x3e5   : > { %2880 = vperm.xlu0 %3977, %v2877_v3  }
 0x3fa   : > { %v3617_v35 = vpop.f32.mrb[32].mxu1 }
 0x3fb   : > { %v2543_v58 = vadd.f32 %v3617_v35, %v5285_v26  ;;  %v2537_v47 = vpop.f32.mrb[33].mxu1 }
 0x3fc   : > { %v2538_v2 = vadd.f32 %v5285_v26, %v2537_v47 }
 0x3fd   : > { %v2617_v62 = vmax.f32 %v2543_v58, 0.0 }
 0x3fe   : > { %v2616_v61 = vmax.f32 %v2538_v2, 0.0 }
 0x400   : > { %v3826_v41 = vpack.c.bf16 %v2617_v62, %v2616_v61 }
 0x402   : > { %3828 = vmatpush3.bf16.xpose.msk.msra.mxu0 %vm5291_vm11, %v3826_v41 }
 0x403   : > { %3829 = vmatprep.subr.bf16.mxu0 %v4054_v28 }
 0x404   : > { %v3620_v0 = vpop.f32.mrb[34].mxu1 }
 0x405   : > { %v2553_v13 = vadd.f32 %v3620_v0, %v5285_v26  ;;  %v2547_v18 = vpop.f32.mrb[35].mxu1 }
 0x406   : > { %v2548_v45 = vadd.f32 %v5285_v26, %v2547_v18 }
 0x407   : > { %v2619_v22 = vmax.f32 %v2553_v13, 0.0 }
 0x408   : > { %v2618_v14 = vmax.f32 %v2548_v45, 0.0 }
 0x409   : > { %v2095_v20 = vpop.xlane.xlu1 %2094 }
 0x40a   : > { %v3830_v33 = vpack.c.bf16 %v2619_v22, %v2618_v14  ;;  %v2139_v56 = vmul.f32 %v2095_v20, %v4792_v38  ;;  %v2092_v9 = vpop.xlane.xlu0 %2091 }
 0x40b   : > { %v2138_v57 = vmul.f32 %v2092_v9, %v4795_v51 }
 0x40c   : > { %v2159_v24 = vadd.f32 %v5303_v31, %v2139_v56  ;;  %3832 = vmatpush3.bf16.xpose.msk.msra.mxu0 %vm5291_vm11, %v3830_v33 }
 0x40d   : > { %v2158_v10 = vadd.f32 %v5303_v31, %v2138_v57  ;;  %3833 = vmatprep.subr.bf16.mxu0 %v4054_v28 }
 0x40e   : > { %v2175_v15 = vadd.f32 %v2159_v24, %v5153_v53 }
 0x40f   : > { %v2174_v11 = vadd.f32 %v2158_v10, %v5156_v54 }
 0x411   : > { %v3858_v51 = vpack.c.bf16 %v2175_v15, %v2174_v11 }
 0x412   : > { %v3623_v17 = vpop.f32.mrb[36].mxu1 }
 0x413   : > { %v2563_v48 = vadd.f32 %v3623_v17, %v5285_v26  ;;  %v2557_v46 = vpop.f32.mrb[37].mxu1  ;;  %v2101_v49 = vpop.xlane.xlu1 %2100  ;;  %3860 = vmatpush3.bf16.xpose.msk.msra.mxu1 %vm5316_vm12, %v3858_v51 }
 0x414   : > { %v2558_v3 = vadd.f32 %v5285_v26, %v2557_v46  ;;  %v2141_v53 = vmul.f32 %v2101_v49, %v4816_v60  ;;  %v2098_v54 = vpop.xlane.xlu0 %2097  ;;  %3861 = vmatprep.subr.bf16.mxu1 %v4054_v28 }
 0x415   : > { %v2621_v35 = vmax.f32 %v2563_v48, 0.0  ;;  %v2140_v58 = vmul.f32 %v2098_v54, %v4819_v6 }
 0x416   : > { %v2620_v47 = vmax.f32 %v2558_v3, 0.0  ;;  %v2161_v2 = vadd.f32 %v5303_v31, %v2141_v53 }
 0x417   : > { %v2160_v62 = vadd.f32 %v5303_v31, %v2140_v58 }
 0x418   : > { %v3834_v61 = vpack.c.bf16 %v2621_v35, %v2620_v47  ;;  %v2177_v41 = vadd.f32 %v2161_v2, %v5171_v55 }
 0x419   : > { %v2176_v0 = vadd.f32 %v2160_v62, %v5176_v5 }
 0x41a   : > { %3836 = vmatpush3.bf16.xpose.msk.msra.mxu0 %vm5291_vm11, %v3834_v61 }
 0x41b   : > { %v3862_v60 = vpack.c.bf16 %v2177_v41, %v2176_v0  ;;  %3837 = vmatprep.subr.bf16.mxu0 %v4054_v28 }
 0x41c   : > { %v3626_v13 = vpop.f32.mrb[38].mxu1 }
 0x41d   : > { %v2573_v18 = vadd.f32 %v3626_v13, %v5285_v26  ;;  %v2567_v6 = vpop.f32.mrb[39].mxu1  ;;  %3864 = vmatpush3.bf16.xpose.msk.msra.mxu1 %vm5316_vm12, %v3862_v60 }
 0x41e   : > { %v2568_v45 = vadd.f32 %v5285_v26, %v2567_v6  ;;  %3865 = vmatprep.subr.bf16.mxu1 %v4054_v28 }
 0x41f   : > { %v2623_v55 = vmax.f32 %v2573_v18, 0.0 }
 0x420   : > { %v2622_v22 = vmax.f32 %v2568_v45, 0.0 }
 0x421   : > { %v2107_v5 = vpop.xlane.xlu1 %2106 }
 0x422   : > { %v3838_v14 = vpack.c.bf16 %v2623_v55, %v2622_v22  ;;  %v2143_v20 = vmul.f32 %v2107_v5, %v4840_v21  ;;  %v2104_v33 = vpop.xlane.xlu0 %2103 }
 0x423   : > { %v2142_v56 = vmul.f32 %v2104_v33, %v4843_v25 }
 0x424   : > { %v2163_v9 = vadd.f32 %v5303_v31, %v2143_v20  ;;  %3840 = vmatpush3.bf16.xpose.msk.msra.mxu0 %vm5291_vm11, %v3838_v14 }
 0x425   : > { %v2162_v57 = vadd.f32 %v5303_v31, %v2142_v56  ;;  %3841 = vmatprep.subr.bf16.mxu0 %v4054_v28 }
 0x426   : > { %v2179_v24 = vadd.f32 %v2163_v9, %v5189_v39 }
 0x427   : > { %v2178_v10 = vadd.f32 %v2162_v57, %v5192_v37 }
 0x429   : > { %v3866_v15 = vpack.c.bf16 %v2179_v24, %v2178_v10 }
 0x42a   : > { %v3629_v11 = vpop.f32.mrb[40].mxu1 }
 0x42b   : > { %v2583_v21 = vadd.f32 %v3629_v11, %v5285_v26  ;;  %v2577_v51 = vpop.f32.mrb[41].mxu1  ;;  %v2113_v17 = vpop.xlane.xlu1 %2112  ;;  %3868 = vmatpush3.bf16.xpose.msk.msra.mxu1 %vm5316_vm12, %v3866_v15 }
 0x42c   : > { %v2578_v25 = vadd.f32 %v5285_v26, %v2577_v51  ;;  %v2145_v48 = vmul.f32 %v2113_v17, %v4864_v34  ;;  %v2110_v46 = vpop.xlane.xlu0 %2109  ;;  %3869 = vmatprep.subr.bf16.mxu1 %v4054_v28 }
 0x42d   : > { %v2625_v49 = vmax.f32 %v2583_v21, 0.0  ;;  %v2144_v39 = vmul.f32 %v2110_v46, %v4867_v8 }
 0x42e   : > { %v2624_v37 = vmax.f32 %v2578_v25, 0.0  ;;  %v2165_v3 = vadd.f32 %v5303_v31, %v2145_v48 }
 0x42f   : > { %v2164_v53 = vadd.f32 %v5303_v31, %v2144_v39 }
 0x430   : > { %v3842_v54 = vpack.c.bf16 %v2625_v49, %v2624_v37  ;;  %v2181_v35 = vadd.f32 %v2165_v3, %v5205_v12 }
 0x431   : > { %v2180_v58 = vadd.f32 %v2164_v53, %v5208_v52 }
 0x432   : > { %3844 = vmatpush3.bf16.xpose.msk.msra.mxu0 %vm5291_vm11, %v3842_v54  ;;  %v2633_v54 = vld [vmem:[%s5479_s9] sm:$0x1] }
 0x433   : > { %v3870_v34 = vpack.c.bf16 %v2181_v35, %v2180_v58  ;;  %3845 = vmatprep.subr.bf16.mxu0 %v4054_v28 }
 0x434   : > { %v3632_v47 = vpop.f32.mrb[42].mxu1 }
 0x435   : > { %v2593_v2 = vadd.f32 %v3632_v47, %v5285_v26  ;;  %v2587_v8 = vpop.f32.mrb[43].mxu1  ;;  %3872 = vmatpush3.bf16.xpose.msk.msra.mxu1 %vm5316_vm12, %v3870_v34 }
 0x436   : > { %v2588_v62 = vadd.f32 %v5285_v26, %v2587_v8  ;;  %3873 = vmatprep.subr.bf16.mxu1 %v4054_v28  ;;  %v2884_v8 = vshrl.u32 %v417_v40, 7 }
 0x437   : > { %v2627_v12 = vmax.f32 %v2593_v2, 0.0 }
 0x438   : > { %v2626_v61 = vmax.f32 %v2588_v62, 0.0 }
 0x439   : > { %v2119_v52 = vpop.xlane.xlu1 %2118 }
 0x43a   : > { %v3846_v41 = vpack.c.bf16 %v2627_v12, %v2626_v61  ;;  %v2147_v0 = vmul.f32 %v2119_v52, %v4884_v42  ;;  %v2116_v60 = vpop.xlane.xlu0 %2115 }
 0x43b   : > { %v2146_v13 = vmul.f32 %v2116_v60, %v4887_v43 }
 0x43c   : > { %v2167_v18 = vadd.f32 %v5303_v31, %v2147_v0  ;;  %3848 = vmatpush3.bf16.xpose.msk.msra.mxu0 %vm5291_vm11, %v3846_v41 }
 0x43d   : > { %v2166_v6 = vadd.f32 %v5303_v31, %v2146_v13  ;;  %3849 = vmatprep.subr.bf16.mxu0 %v4054_v28 }
 0x43e   : > { %v2183_v45 = vadd.f32 %v2167_v18, %v5221_v23 }
 0x43f   : > { %v2182_v55 = vadd.f32 %v2166_v6, %v5224_v32 }
 0x441   : > { %v3874_v22 = vpack.c.bf16 %v2183_v45, %v2182_v55 }
 0x442   : > { %v3635_v5 = vpop.f32.mrb[44].mxu1 }
 0x443   : > { %v2603_v42 = vadd.f32 %v3635_v5, %v5285_v26  ;;  %v2597_v14 = vpop.f32.mrb[45].mxu1  ;;  %v2125_v20 = vpop.xlane.xlu1 %2124  ;;  %3876 = vmatpush3.bf16.xpose.msk.msra.mxu1 %vm5316_vm12, %v3874_v22 }
 0x444   : > { %v2598_v43 = vadd.f32 %v5285_v26, %v2597_v14  ;;  %v2149_v33 = vmul.f32 %v2125_v20, %v4904_v59  ;;  %v2122_v56 = vpop.xlane.xlu0 %2121  ;;  %3877 = vmatprep.subr.bf16.mxu1 %v4054_v28 }
 0x445   : > { %v2629_v9 = vmax.f32 %v2603_v42, 0.0  ;;  %v2148_v23 = vmul.f32 %v2122_v56, %v4907_v7 }
 0x446   : > { %v2628_v32 = vmax.f32 %v2598_v43, 0.0  ;;  %v2169_v57 = vadd.f32 %v5303_v31, %v2149_v33 }
 0x447   : > { %v2168_v24 = vadd.f32 %v5303_v31, %v2148_v23 }
 0x448   : > { %v3850_v10 = vpack.c.bf16 %v2629_v9, %v2628_v32  ;;  %v2185_v15 = vadd.f32 %v2169_v57, %v5237_v50 }
 0x449   : > { %v2184_v11 = vadd.f32 %v2168_v24, %v5240_v1 }
 0x44a   : > { %3852 = vmatpush3.bf16.xpose.msk.msra.mxu0 %vm5291_vm11, %v3850_v10 }
 0x44b   : > { %v3878_v59 = vpack.c.bf16 %v2185_v15, %v2184_v11  ;;  %3853 = vmatprep.subr.bf16.mxu0 %v4054_v28 }
 0x44c   : > { %v3638_v21 = vpop.f32.mrb[46].mxu1 }
 0x44d   : > { %v2613_v51 = vadd.f32 %v3638_v21, %v5285_v26  ;;  %v2607_v7 = vpop.f32.mrb[47].mxu1  ;;  %3880 = vmatpush3.bf16.xpose.msk.msra.mxu1 %vm5316_vm12, %v3878_v59 }
 0x44e   : > { %v2608_v17 = vadd.f32 %v5285_v26, %v2607_v7  ;;  %3881 = vmatprep.subr.bf16.mxu1 %v4054_v28 }
 0x44f   : > { %v2631_v50 = vmax.f32 %v2613_v51, 0.0 }
 0x450   : > { %v2630_v25 = vmax.f32 %v2608_v17, 0.0 }
 0x451   : > { %v2131_v1 = vpop.xlane.xlu1 %2130 }
 0x452   : > { %v3854_v48 = vpack.c.bf16 %v2631_v50, %v2630_v25  ;;  %v2151_v46 = vmul.f32 %v2131_v1, %v4924_v16  ;;  %v2128_v49 = vpop.xlane.xlu0 %2127 }
 0x453   : > { %v2150_v39 = vmul.f32 %v2128_v49, %v4927_v19 }
 0x454   : > { %v2171_v37 = vadd.f32 %v5303_v31, %v2151_v46  ;;  %3856 = vmatpush3.bf16.xpose.msk.msra.mxu0 %vm5291_vm11, %v3854_v48 }
 0x455   : > { %v2170_v3 = vadd.f32 %v5303_v31, %v2150_v39 }
 0x456   : > { %v2187_v26 = vadd.f32 %v2171_v37, %v5253_v4 }
 0x457   : > { %v2186_v53 = vadd.f32 %v2170_v3, %v5256_v30 }
 0x459   : > { %v3882_v35 = vpack.c.bf16 %v2187_v26, %v2186_v53 }
 0x45b   : > { %v2137_v16 = vpop.xlane.xlu1 %2136  ;;  %3884 = vmatpush3.bf16.xpose.msk.msra.mxu1 %vm5316_vm12, %v3882_v35  ;;  %3672 = vmatmul.mubr.msk.f32.vlgmr.msra.gmra.mrb[48].mxu0 %vm2634_vm10, %v2633_v54 }
 0x45c   : > { %v2153_v19 = vmul.f32 %v2137_v16, %v4944_v27  ;;  %v2134_v44 = vpop.xlane.xlu0 %2133  ;;  %3885 = vmatprep.subr.bf16.mxu1 %v4054_v28  ;;  %v2632_v27 = vld [vmem:[%s5478_s8] sm:$0x1] }
 0x45d   : > { %v2152_v4 = vmul.f32 %v2134_v44, %v4947_v29 }
 0x45e   : > { %v2173_v30 = vadd.f32 %v5303_v31, %v2153_v19 }
 0x45f   : > { %v2172_v58 = vadd.f32 %v5303_v31, %v2152_v4  ;;  %v2885_v31 = vsub.s32 0, %v2884_v8 }
 0x460   : > { %v2189_v34 = vadd.f32 %v2173_v30, %v5269_v63 }
 0x461   : > { %v2188_v47 = vadd.f32 %v2172_v58, %v5272_v36 }
 0x463   : > { %v3886_v2 = vpack.c.bf16 %v2189_v34, %v2188_v47 }
 0x464   : > { %v2881_v63 = vpop.permute.xlu0 %2880 }
 0x465   : > { %3888 = vmatpush3.bf16.xpose.msk.msra.mxu1 %vm5316_vm12, %v3886_v2  ;;  %v2886_v62 = vrot.slane %v2881_v63, %v2885_v31 }
 0x46c   : > { %3707 = vmatmul.mubr.msk.f32.vlgmr.msra.gmra.mrb[48].mxu1 %vm1845_vm8, %v2632_v27 }
 0x52e   : > { %v2752_v29 = vpop.f32.mrb[48].mxu0 }
 0x52f   : > { %v3673_v28 = vpop.f32.mrb[49].mxu0 }
 0x53f   : > { %v2873_v36 = vpop.f32.mrb[48].mxu1 }
 0x540   : > { %v2874_v12 = vadd.f32 %v2873_v36, %v2752_v29  ;;  %v3708_v61 = vpop.f32.mrb[49].mxu1 }
 0x542   : > { %v2887_v38 = vadd.f32 %v2886_v62, %v2874_v12 }
 0x544   : > { %v3175_v52 = vmul.f32 -1.442695, %v2887_v38 }
 0x546   : > { %3978 = vpow2.f32 %v3175_v52 }
 0x550   : > { %v3979_v41 = vpop.eup %3978 }
 0x551   : > { %v2891_v0 = vadd.f32 1.0, %v3979_v41 }
 0x553   : > { %3980 = vrcp.f32 %v2891_v0 }
 0x55d   : > { %v3981_v40 = vpop.eup %3980 }
 0x55e   : > { %2894 = vst [vmem:[%s381_s26] sm:$0x1] %v3981_v40 }
 0x55f   : > { %3995 = shalt.err (!%p3992_p3)
}
 0x560   : > { %s3996_s30 = scalar_lea.hbm %s5428_s15, 16  ;;  %s4000_s13 = scalar_lea.hbm %s5481_s11, 48 }
 0x561   : > { %p3997_p4 = scmp.ne.s32.totalorder %s5428_s15, %s3996_s30  ;;  %p4001_p9 = scmp.lt.u32.totalorder %s5428_s15, %s5481_s11 }
 0x562   : > { %p4002_p10 = scmp.lt.u32.totalorder %s4000_s13, %s3996_s30  ;;  %p4004_p12 = scmp.lt.u32.totalorder %s3996_s30, %s5428_s15 }
 0x563   : > { %p3998_p7 = pnand %p3997_p4, %p4155_p5 }
 0x564   : > { %p4003_p11 = por %p4002_p10, %p4001_p9 }
 0x565   : > { %p3999_p8 = pneg %p3998_p7 }
 0x566   : > { %p4005_p13 = por %p4004_p12, %p4003_p11 }
 0x568   : > { %p4006_p0 = pnand %p4005_p13, %p3999_p8 }
 0x56a   : > { %4009 = shalt.err (!%p4006_p0)
}
 0x56b   : > { %3889 = dma.vmem_to_hbm [thread:$0]  (%p4155_p5), %s5430_s12, 16, %s5428_s15, %s2896_s16  }
 0x56c PF: > { %p3895_p1 = scmp.ge.s32.totalorder %s4044_s22, 2  ;;  %s2920_s18 = sand.u32 1, %s4032_s19  }
 0x56d   : > { %s2921_s17 = scalar_lea.sflag [#allocation4], %s2920_s18 }
 0x56e   : > { %p3892_p2 = pnand %p3895_p1, %p4159_p6 }
 0x570   : > { %4027 = dma.done.wait (!%p3892_p2), %s2921_s17, 16  }
 0x571   : > { %4029 = vsyncadd (!%p3892_p2), %s2921_s17, 4294967280  ;;  %p23_p3 = scmp.ge.s32.totalorder %s4143_s24, 5   ;;  %s5488_s19 = smov %s4036_s20 }
 0x572   : > { %s5489_s20 = smov %s4040_s21  ;;  %s5490_s21 = smov %s4153_s27 }
 0x573   : > { %s5491_s22 = smov %s4143_s24  ;;  %25 = sbr.rel (!%p23_p3) target bundleno = 6 (0x6), region = 99 }
 0x57a   :  { %2925 = vsyncpa [#allocation4], 1 }
 0x57b   :  { %2927 = vsyncpa [#allocation4 + $0x1], 1 }

</bundles_post_ra>
